<compile_context>
chip_gen: v7x
topology: tpu7x:2x2x1
jax: 0.10.0
libtpu: 0.0.40
codegen_flags: <defaults>
</compile_context>

<pallas_src>
import math

import jax
import jax.numpy as jnp
from jax.experimental import pallas as pl
from jax.experimental.pallas import tpu as pltpu

LANES = 128       # lane-padded feature width for all layers
BN_EPS = 1e-5
MASK_VAL = -1e30  # additive mask value for non-edges


# --------------------------------------------------------------------------------------
# Fused kernel: grid=(num_layers,), one TransformerConv(+BN+ReLU) layer per grid step.
# --------------------------------------------------------------------------------------
def _transformer_stack_kernel(x_ref, madd_ref, w_ref, vec_ref, out_ref):
    l = pl.program_id(0)
    last = pl.num_programs(0) - 1

    # Layer 0: seed the VMEM-resident output block (constant index_map => it doubles as
    # the activation carry for the whole layer stack).
    @pl.when(l == 0)
    def _():
        out_ref[...] = x_ref[...]

    h = out_ref[...]                       # (N, P) f32 carry; padded rows/cols are benign
    hb = h.astype(jnp.bfloat16)            # bf16 MXU operand, f32 accumulation

    wq = w_ref[0, 0]                       # (P, P) bf16, pre-scaled by 1/sqrt(C)
    wk = w_ref[0, 1]
    wv = w_ref[0, 2]                       # BN scale folded in (hidden layers)
    wsk = w_ref[0, 3]                      # BN scale folded in (hidden layers)

    vecs = vec_ref[0]                      # (8, P) f32 biases (elementwise math stays f32)
    bq = vecs[0:1, :]                      # pre-scaled by 1/sqrt(C)
    bk = vecs[1:2, :]
    bv = vecs[2:3, :]                      # BN scale folded in
    bsk = vecs[3:4, :]                     # BN scale/shift folded in

    # Linear transforms (MXU, bf16 x bf16 -> f32 accumulate).
    q = jnp.dot(hb, wq, preferred_element_type=jnp.float32) + bq
    k = jnp.dot(hb, wk, preferred_element_type=jnp.float32) + bk
    v = jnp.dot(hb, wv, preferred_element_type=jnp.float32) + bv
    skip = jnp.dot(hb, wsk, preferred_element_type=jnp.float32) + bsk

    # Attention logits e[i,j] = q[i].k[j] (transpose folded into dot_general, MXU) plus the
    # additive adjacency mask (0 on edges j->i, -1e30 elsewhere): one add per element.
    e = jax.lax.dot_general(q.astype(jnp.bfloat16), k.astype(jnp.bfloat16),
                            (((1,), (1,)), ((), ())),
                            preferred_element_type=jnp.float32)        # (N, N) f32
    e = e + madd_ref[...].astype(jnp.float32)

    # Masked softmax over source nodes j (all f32).  Off-graph entries sit ~1e30 below the
    # row max so exp underflows to exactly 0 -- no multiplicative mask needed.  Rows with
    # no incoming edges (incl. padded rows) have max ~ -1e30; row_valid zeroes their alpha
    # so isolated targets aggregate to exactly 0 (TransformerConv adds no self loops).
    m = jnp.max(e, axis=-1, keepdims=True)
    p = jnp.exp(e - m)
    denom = jnp.sum(p, axis=-1, keepdims=True)            # >= 1, never zero
    row_valid = (m > -1e20).astype(jnp.float32)           # (N, 1)
    inv = pl.reciprocal(denom, approx=True) * row_valid   # EUP slot
    alpha = p * inv

    # Aggregate messages + root/skip connection (MXU).
    agg = jnp.dot(alpha.astype(jnp.bfloat16), v.astype(jnp.bfloat16),
                  preferred_element_type=jnp.float32)
    h_new = agg + skip

    # Exactly one store per layer.  BatchNorm is already folded into wv/bv/wsk/bsk
    # host-side, so hidden layers only need the ReLU; the last layer is identity.
    @pl.when(l != last)
    def _():
        out_ref[...] = jnp.maximum(h_new, 0.0)

    @pl.when(l == last)
    def _():
        out_ref[...] = h_new


# --------------------------------------------------------------------------------------
# Host-side parameter packing (lane-padded, per-layer slabs; BN + 1/sqrt(C) folded).
# --------------------------------------------------------------------------------------
def _pad2(a):
    out = jnp.zeros((LANES, LANES), jnp.float32)
    return out.at[: a.shape[0], : a.shape[1]].set(a)


def pack_layer_params(layer_params):
    """(L, 4, P, P) bf16 weight slab + (L, 8, P) f32 bias slab."""
    n_layers = len(layer_params)
    w_slabs, vec_slabs = [], []
    for li, p in enumerate(layer_params):
        fout = p["wq"].shape[1]
        qscale = 1.0 / math.sqrt(fout)                 # fold 1/sqrt(out_channels) into q
        if li == n_layers - 1:
            s = jnp.ones((fout,), jnp.float32)         # last layer: no BN
            t = jnp.zeros((fout,), jnp.float32)
        else:
            # Eval-mode BatchNorm1d is a per-channel affine y = x*s + t; it commutes with
            # the alpha@v aggregation, so fold it into the value and skip projections.
            s = p["gamma"] * jax.lax.rsqrt(p["var"] + BN_EPS)
            t = p["beta"] - p["mean"] * s
        w_slabs.append(jnp.stack([
            _pad2(p["wq"] * qscale),
            _pad2(p["wk"]),
            _pad2(p["wv"] * s[None, :]),
            _pad2(p["wsk"] * s[None, :]),
        ], axis=0).astype(jnp.bfloat16))
        vec = jnp.zeros((8, LANES), jnp.float32)       # 8 rows keeps the (8,128) tile
        vec = vec.at[0, :fout].set(p["bq"] * qscale)
        vec = vec.at[1, :fout].set(p["bk"])
        vec = vec.at[2, :fout].set(p["bv"] * s)
        vec = vec.at[3, :fout].set(p["bsk"] * s + t)
        vec_slabs.append(vec)
    return jnp.stack(w_slabs, axis=0), jnp.stack(vec_slabs, axis=0)


def graph_transformer_forward(x, edge_index, layer_params):
    """Full fused forward pass: one pallas_call for the whole layer stack."""
    n, f_in = x.shape
    f_out = layer_params[-1]["wq"].shape[1]
    n_layers = len(layer_params)
    # Pad nodes to a lane-dense multiple of 128: (N, N) mask / logit rows become full
    # vregs (unmasked loads/stores, full-width row reductions).
    n_pad = ((n + LANES - 1) // LANES) * LANES

    # NOTE: padded node rows pick up bias terms layer over layer; their mask columns are
    # -1e30 (never attended to) and they are sliced off below, so results are unaffected.
    x_p = jnp.zeros((n_pad, LANES), jnp.float32).at[:n, :f_in].set(x.astype(jnp.float32))

    # Additive adjacency mask (bf16): madd[i, j] = 0 iff edge j -> i, else -1e30.
    # NOTE: duplicate edges collapse to one edge (PyG would count each as a message).
    madd = (jnp.full((n_pad, n_pad), MASK_VAL, jnp.float32)
            .at[edge_index[1], edge_index[0]].set(0.0)
            .astype(jnp.bfloat16))

    w, vec = pack_layer_params(layer_params)

    flops = n_layers * (4 * 2 * n_pad * LANES * LANES + 2 * 2 * n_pad * n_pad * LANES)
    transcendentals = n_layers * (n_pad * n_pad + n_pad)          # exp + reciprocal
    bytes_accessed = (x_p.size * 4 + madd.size * 2 + w.size * 2 + vec.size * 4
                      + n_pad * LANES * 4)

    grid_spec = pltpu.PrefetchScalarGridSpec(
        num_scalar_prefetch=0,
        grid=(n_layers,),
        in_specs=[
            pl.BlockSpec((n_pad, LANES), lambda l: (0, 0)),              # x    (resident)
            pl.BlockSpec((n_pad, n_pad), lambda l: (0, 0)),              # mask (resident)
            pl.BlockSpec((1, 4, LANES, LANES), lambda l: (l, 0, 0, 0)),  # weights / layer
            pl.BlockSpec((1, 8, LANES), lambda l: (l, 0, 0)),            # biases  / layer
        ],
        # Constant index_map => the output block stays VMEM-resident across the layer grid
        # (it is the activation carry); HBM writeback happens once at the end.
        out_specs=pl.BlockSpec((n_pad, LANES), lambda l: (0, 0)),
    )

    out = pl.pallas_call(
        _transformer_stack_kernel,
        out_shape=jax.ShapeDtypeStruct((n_pad, LANES), jnp.float32),
        grid_spec=grid_spec,
        compiler_params=pltpu.CompilerParams(
            dimension_semantics=("arbitrary",)),       # layers are sequential (carry dep)
        cost_estimate=pl.CostEstimate(flops=flops, transcendentals=transcendentals,
                                      bytes_accessed=bytes_accessed),
    )(x_p, madd, w, vec)

    return out[:n, :f_out]


# --------------------------------------------------------------------------------------
# Parameter init (fresh-module-style: BN identity running stats).
# --------------------------------------------------------------------------------------
def _glorot(key, shape):
    fan_in, fan_out = shape
    limit = math.sqrt(6.0 / (fan_in + fan_out))
    return jax.random.uniform(key, shape, jnp.float32, -limit, limit)


def init_transformer_conv(key, in_dim, out_dim):
    ks = jax.random.split(key, 8)
    bscale = 1.0 / math.sqrt(max(in_dim, 1))
    return {
        "wq": _glorot(ks[0], (in_dim, out_dim)),
        "bq": jax.random.uniform(ks[4], (out_dim,), jnp.float32, -bscale, bscale),
        "wk": _glorot(ks[1], (in_dim, out_dim)),
        "bk": jax.random.uniform(ks[5], (out_dim,), jnp.float32, -bscale, bscale),
        "wv": _glorot(ks[2], (in_dim, out_dim)),
        "bv": jax.random.uniform(ks[6], (out_dim,), jnp.float32, -bscale, bscale),
        "wsk": _glorot(ks[3], (in_dim, out_dim)),
        "bsk": jax.random.uniform(ks[7], (out_dim,), jnp.float32, -bscale, bscale),
        # BatchNorm1d eval-mode running stats (identity at init; unused on last layer).
        "gamma": jnp.ones((out_dim,), jnp.float32),
        "beta": jnp.zeros((out_dim,), jnp.float32),
        "mean": jnp.zeros((out_dim,), jnp.float32),
        "var": jnp.ones((out_dim,), jnp.float32),
    }


if __name__ == "__main__":
    key = jax.random.PRNGKey(0)

    num_nodes = 32
    num_edges = 64
    input_dim, hidden_dim, output_dim = 8, 16, 4
    n_layers = 3   # heads = 1 (module default)

    k_x, k_e0, k_e1, k_p = jax.random.split(key, 4)
    x = jax.random.normal(k_x, (num_nodes, input_dim), jnp.float32)
    edge_index = jnp.stack(
        [
            jax.random.randint(k_e0, (num_edges,), 0, num_nodes),   # source j
            jax.random.randint(k_e1, (num_edges,), 0, num_nodes),   # target i
        ],
        axis=0,
    ).astype(jnp.int32)

    dims = [input_dim] + [hidden_dim] * (n_layers - 1) + [output_dim]
    pkeys = jax.random.split(k_p, n_layers)
    layer_params = [
        init_transformer_conv(pkeys[i], dims[i], dims[i + 1]) for i in range(n_layers)
    ]

    out = graph_transformer_forward(x, edge_index, layer_params)
    out = jax.block_until_ready(out)

    assert out.shape == (num_nodes, output_dim), out.shape
    assert bool(jnp.all(jnp.isfinite(out)))
    print("KERNEL_OK")
</pallas_src>

<mosaic_0001>
module attributes {stable_mosaic.version = 11 : i64} {
  func.func @_transformer_stack_kernel(%arg0: i32, %arg1: memref<128x128xf32, #tpu.memory_space<vmem>>, %arg2: memref<128x128xbf16, #tpu.memory_space<vmem>>, %arg3: memref<1x4x128x128xbf16, #tpu.memory_space<vmem>>, %arg4: memref<1x8x128xf32, #tpu.memory_space<vmem>>, %arg5: memref<128x128xf32, #tpu.memory_space<vmem>>) attributes {dimension_semantics = [#tpu.dimension_semantics<arbitrary>], iteration_bounds = array<i64: 3>, scalar_prefetch = 0 : i64, scratch_operands = 0 : i64, tpu.core_type = #tpu.core_type<tc>, window_params = [{pipeline_mode = #tpu.pipeline_mode<synchronous>, transform_indices = @transform_0, window_bounds = array<i64: 128, 128>}, {pipeline_mode = #tpu.pipeline_mode<synchronous>, transform_indices = @transform_1, window_bounds = array<i64: 128, 128>}, {transform_indices = @transform_2, window_bounds = array<i64: 1, 4, 128, 128>}, {transform_indices = @transform_3, window_bounds = array<i64: 1, 8, 128>}, {pipeline_mode = #tpu.pipeline_mode<synchronous>, transform_indices = @transform_4, window_bounds = array<i64: 128, 128>}]} {
    %c0_i32 = arith.constant 0 : i32
    %0 = arith.cmpi eq, %arg0, %c0_i32 : i32
    %1 = arith.extui %0 : i1 to i32
    %c0_i32_0 = arith.constant 0 : i32
    %2 = arith.cmpi ne, %1, %c0_i32_0 : i32
    scf.if %2 {
      %c0_31 = arith.constant 0 : index
      %c0_32 = arith.constant 0 : index
      %62 = vector.load %arg1[%c0_31, %c0_32] : memref<128x128xf32, #tpu.memory_space<vmem>>, vector<128x128xf32>
      %c0_33 = arith.constant 0 : index
      %c0_34 = arith.constant 0 : index
      %63 = vector.load %arg5[%c0_33, %c0_34] : memref<128x128xf32, #tpu.memory_space<vmem>>, vector<128x128xf32>
      tpu.vector_store %arg5[%c0_33, %c0_34], %62 {strides = array<i32>} : memref<128x128xf32, #tpu.memory_space<vmem>>, vector<128x128xf32>,
    } else {
    }
    %c0 = arith.constant 0 : index
    %c0_1 = arith.constant 0 : index
    %3 = vector.load %arg5[%c0, %c0_1] : memref<128x128xf32, #tpu.memory_space<vmem>>, vector<128x128xf32>
    %4 = arith.truncf %3 : vector<128x128xf32> to vector<128x128xbf16>
    %c0_2 = arith.constant 0 : index
    %c0_3 = arith.constant 0 : index
    %c0_4 = arith.constant 0 : index
    %c0_5 = arith.constant 0 : index
    %5 = vector.load %arg3[%c0_2, %c0_3, %c0_4, %c0_5] : memref<1x4x128x128xbf16, #tpu.memory_space<vmem>>, vector<1x1x128x128xbf16>
    %6 = vector.shape_cast %5 : vector<1x1x128x128xbf16> to vector<128x128xbf16>
    %c0_6 = arith.constant 0 : index
    %c1 = arith.constant 1 : index
    %c0_7 = arith.constant 0 : index
    %c0_8 = arith.constant 0 : index
    %7 = vector.load %arg3[%c0_6, %c1, %c0_7, %c0_8] : memref<1x4x128x128xbf16, #tpu.memory_space<vmem>>, vector<1x1x128x128xbf16>
    %8 = vector.shape_cast %7 : vector<1x1x128x128xbf16> to vector<128x128xbf16>
    %c0_9 = arith.constant 0 : index
    %c2 = arith.constant 2 : index
    %c0_10 = arith.constant 0 : index
    %c0_11 = arith.constant 0 : index
    %9 = vector.load %arg3[%c0_9, %c2, %c0_10, %c0_11] : memref<1x4x128x128xbf16, #tpu.memory_space<vmem>>, vector<1x1x128x128xbf16>
    %10 = vector.shape_cast %9 : vector<1x1x128x128xbf16> to vector<128x128xbf16>
    %c0_12 = arith.constant 0 : index
    %c3 = arith.constant 3 : index
    %c0_13 = arith.constant 0 : index
    %c0_14 = arith.constant 0 : index
    %11 = vector.load %arg3[%c0_12, %c3, %c0_13, %c0_14] : memref<1x4x128x128xbf16, #tpu.memory_space<vmem>>, vector<1x1x128x128xbf16>
    %12 = vector.shape_cast %11 : vector<1x1x128x128xbf16> to vector<128x128xbf16>
    %c0_15 = arith.constant 0 : index
    %c0_16 = arith.constant 0 : index
    %c0_17 = arith.constant 0 : index
    %13 = vector.load %arg4[%c0_15, %c0_16, %c0_17] : memref<1x8x128xf32, #tpu.memory_space<vmem>>, vector<1x8x128xf32>
    %14 = vector.shape_cast %13 : vector<1x8x128xf32> to vector<8x128xf32>
    %15 = vector.extract_strided_slice %14 {offsets = [0, 0], sizes = [1, 128], strides = [1, 1]} : vector<8x128xf32> to vector<1x128xf32>
    %16 = vector.extract_strided_slice %14 {offsets = [1, 0], sizes = [1, 128], strides = [1, 1]} : vector<8x128xf32> to vector<1x128xf32>
    %17 = vector.extract_strided_slice %14 {offsets = [2, 0], sizes = [1, 128], strides = [1, 1]} : vector<8x128xf32> to vector<1x128xf32>
    %18 = vector.extract_strided_slice %14 {offsets = [3, 0], sizes = [1, 128], strides = [1, 1]} : vector<8x128xf32> to vector<1x128xf32>
    %cst = arith.constant dense<0.000000e+00> : vector<128x128xf32>
    %19 = tpu.matmul %4, %6, %cst {dimension_numbers = #tpu.dot_dimension_numbers<[1], [0], [0], [1], [0, 0, 1, 1], [], []>} : vector<128x128xbf16>, vector<128x128xbf16>, vector<128x128xf32> -> vector<128x128xf32>
    %20 = vector.broadcast %15 : vector<1x128xf32> to vector<128x128xf32>
    %21 = arith.addf %19, %20 : vector<128x128xf32>
    %cst_18 = arith.constant dense<0.000000e+00> : vector<128x128xf32>
    %22 = tpu.matmul %4, %8, %cst_18 {dimension_numbers = #tpu.dot_dimension_numbers<[1], [0], [0], [1], [0, 0, 1, 1], [], []>} : vector<128x128xbf16>, vector<128x128xbf16>, vector<128x128xf32> -> vector<128x128xf32>
    %23 = vector.broadcast %16 : vector<1x128xf32> to vector<128x128xf32>
    %24 = arith.addf %22, %23 : vector<128x128xf32>
    %cst_19 = arith.constant dense<0.000000e+00> : vector<128x128xf32>
    %25 = tpu.matmul %4, %10, %cst_19 {dimension_numbers = #tpu.dot_dimension_numbers<[1], [0], [0], [1], [0, 0, 1, 1], [], []>} : vector<128x128xbf16>, vector<128x128xbf16>, vector<128x128xf32> -> vector<128x128xf32>
    %26 = vector.broadcast %17 : vector<1x128xf32> to vector<128x128xf32>
    %27 = arith.addf %25, %26 : vector<128x128xf32>
    %cst_20 = arith.constant dense<0.000000e+00> : vector<128x128xf32>
    %28 = tpu.matmul %4, %12, %cst_20 {dimension_numbers = #tpu.dot_dimension_numbers<[1], [0], [0], [1], [0, 0, 1, 1], [], []>} : vector<128x128xbf16>, vector<128x128xbf16>, vector<128x128xf32> -> vector<128x128xf32>
    %29 = vector.broadcast %18 : vector<1x128xf32> to vector<128x128xf32>
    %30 = arith.addf %28, %29 : vector<128x128xf32>
    %31 = arith.truncf %21 : vector<128x128xf32> to vector<128x128xbf16>
    %32 = arith.truncf %24 : vector<128x128xf32> to vector<128x128xbf16>
    %cst_21 = arith.constant dense<0.000000e+00> : vector<128x128xf32>
    %33 = tpu.matmul %31, %32, %cst_21 {dimension_numbers = #tpu.dot_dimension_numbers<[1], [1], [0], [0], [0, 0, 1, 0], [], []>} : vector<128x128xbf16>, vector<128x128xbf16>, vector<128x128xf32> -> vector<128x128xf32>
    %c0_22 = arith.constant 0 : index
    %c0_23 = arith.constant 0 : index
    %34 = vector.load %arg2[%c0_22, %c0_23] : memref<128x128xbf16, #tpu.memory_space<vmem>>, vector<128x128xbf16>
    %35 = arith.extf %34 : vector<128x128xbf16> to vector<128x128xf32>
    %36 = arith.addf %33, %35 : vector<128x128xf32>
    %cst_24 = arith.constant dense<0xFF800000> : vector<128xf32>
    %37 = vector.multi_reduction <maximumf>, %36, %cst_24 [1] : vector<128x128xf32> to vector<128xf32>
    %38 = vector.shape_cast %37 : vector<128xf32> to vector<128x1xf32>
    %39 = vector.broadcast %38 : vector<128x1xf32> to vector<128x128xf32>
    %40 = arith.subf %36, %39 : vector<128x128xf32>
    %41 = math.exp %40 : vector<128x128xf32>
    %cst_25 = arith.constant dense<0.000000e+00> : vector<128xf32>
    %42 = vector.multi_reduction <add>, %41, %cst_25 [1] : vector<128x128xf32> to vector<128xf32>
    %43 = vector.shape_cast %42 : vector<128xf32> to vector<128x1xf32>
    %cst_26 = arith.constant -1.000000e+20 : f32
    %44 = vector.broadcast %cst_26 : f32 to vector<128x1xf32>
    %45 = arith.cmpf ogt, %38, %44 : vector<128x1xf32>
    %46 = arith.extui %45 : vector<128x1xi1> to vector<128x1xi32>
    %47 = arith.sitofp %46 : vector<128x1xi32> to vector<128x1xf32>
    %48 = tpu.reciprocal %43 {approx = true} : vector<128x1xf32> -> vector<128x1xf32>
    %49 = arith.mulf %48, %47 : vector<128x1xf32>
    %50 = vector.broadcast %49 : vector<128x1xf32> to vector<128x128xf32>
    %51 = arith.mulf %41, %50 : vector<128x128xf32>
    %52 = arith.truncf %51 : vector<128x128xf32> to vector<128x128xbf16>
    %53 = arith.truncf %27 : vector<128x128xf32> to vector<128x128xbf16>
    %cst_27 = arith.constant dense<0.000000e+00> : vector<128x128xf32>
    %54 = tpu.matmul %52, %53, %cst_27 {dimension_numbers = #tpu.dot_dimension_numbers<[1], [0], [0], [1], [0, 0, 1, 1], [], []>} : vector<128x128xbf16>, vector<128x128xbf16>, vector<128x128xf32> -> vector<128x128xf32>
    %55 = arith.addf %54, %30 : vector<128x128xf32>
    %c2_i32 = arith.constant 2 : i32
    %56 = arith.cmpi ne, %arg0, %c2_i32 : i32
    %57 = arith.extui %56 : i1 to i32
    %c0_i32_28 = arith.constant 0 : i32
    %58 = arith.cmpi ne, %57, %c0_i32_28 : i32
    scf.if %58 {
      %cst_31 = arith.constant 0.000000e+00 : f32
      %62 = vector.broadcast %cst_31 : f32 to vector<128x128xf32>
      %63 = arith.maximumf %55, %62 : vector<128x128xf32>
      %c0_32 = arith.constant 0 : index
      %c0_33 = arith.constant 0 : index
      %64 = vector.load %arg5[%c0_32, %c0_33] : memref<128x128xf32, #tpu.memory_space<vmem>>, vector<128x128xf32>
      tpu.vector_store %arg5[%c0_32, %c0_33], %63 {strides = array<i32>} : memref<128x128xf32, #tpu.memory_space<vmem>>, vector<128x128xf32>,
    } else {
    }
    %c2_i32_29 = arith.constant 2 : i32
    %59 = arith.cmpi eq, %arg0, %c2_i32_29 : i32
    %60 = arith.extui %59 : i1 to i32
    %c0_i32_30 = arith.constant 0 : i32
    %61 = arith.cmpi ne, %60, %c0_i32_30 : i32
    scf.if %61 {
      %c0_31 = arith.constant 0 : index
      %c0_32 = arith.constant 0 : index
      %62 = vector.load %arg5[%c0_31, %c0_32] : memref<128x128xf32, #tpu.memory_space<vmem>>, vector<128x128xf32>
      tpu.vector_store %arg5[%c0_31, %c0_32], %55 {strides = array<i32>} : memref<128x128xf32, #tpu.memory_space<vmem>>, vector<128x128xf32>,
    } else {
    }
    return
  }
  func.func @transform_0(%arg0: i32) -> (i32, i32) {
    %c0_i32 = arith.constant 0 : i32
    %c0_i32_0 = arith.constant 0 : i32
    %c0_i32_1 = arith.constant 0 : i32
    return %c0_i32, %c0_i32_0 : i32, i32
  }
  func.func @transform_1(%arg0: i32) -> (i32, i32) {
    %c0_i32 = arith.constant 0 : i32
    %c0_i32_0 = arith.constant 0 : i32
    %c0_i32_1 = arith.constant 0 : i32
    return %c0_i32, %c0_i32_0 : i32, i32
  }
  func.func @transform_2(%arg0: i32) -> (i32, i32, i32, i32) {
    %c0_i32 = arith.constant 0 : i32
    %c0_i32_0 = arith.constant 0 : i32
    %c0_i32_1 = arith.constant 0 : i32
    %c0_i32_2 = arith.constant 0 : i32
    return %arg0, %c0_i32, %c0_i32_0, %c0_i32_1 : i32, i32, i32, i32
  }
  func.func @transform_3(%arg0: i32) -> (i32, i32, i32) {
    %c0_i32 = arith.constant 0 : i32
    %c0_i32_0 = arith.constant 0 : i32
    %c0_i32_1 = arith.constant 0 : i32
    return %arg0, %c0_i32, %c0_i32_0 : i32, i32, i32
  }
  func.func @transform_4(%arg0: i32) -> (i32, i32) {
    %c0_i32 = arith.constant 0 : i32
    %c0_i32_0 = arith.constant 0 : i32
    %c0_i32_1 = arith.constant 0 : i32
    return %c0_i32, %c0_i32_0 : i32, i32
  }
}

</mosaic_0001>

<bundles_post_ra>
// kernel: tpu_custom_call.1
= control target key start
LH: loop header
LB: loop body
LE: loop exit
PB: predicated region body
PF: predicated region fallthrough
CT: control target
= control target key end

     0   :  { %9 = vsyncpa [#allocation3], 0  ;;  %s3153_s0 = inlined_call_operand.hbm [shape: f32[128,128], index: 0, kind: input, shape index: {}]   ;;  %s3154_s1 = inlined_call_operand.hbm [shape: bf16[128,128], index: 1, kind: input, shape index: {}]   ;;  %s3155_s2 = inlined_call_operand.hbm [shape: bf16[3,4,128,128], index: 2, kind: input, shape index: {}]   ;;  %s3156_s3 = inlined_call_operand.hbm [shape: f32[3,8,128], index: 3, kind: input, shape index: {}]   ;;  %s3157_s4 = inlined_call_operand.hbm [shape: f32[128,128], index: 4, kind: output, shape index: {}]  }
   0x1   :  { %10 = vsyncpa [#allocation6], 0 }
   0x2   :  { %11 = vsyncpa [#allocation4], 0  ;;  %s2490_s15 = smov 0   ;;  %s2492_s16 = smov 0  }
   0x3   :  { %s2494_s17 = smov 0   ;;  %s2496_s18 = smov 0  }
   0x4 LB: > { %s2509_s19 = sadd.s32 4294967295, %s2451_s18   ;;  %s2512_s20 = sadd.s32 1, %s2451_s18   ;;  %s2451_s18 = sphi %s2496_s18, %s3186_s18   ;;  %s2447_s17 = sphi %s2494_s17, %s3185_s17   ;;  %s2443_s16 = sphi %s2492_s16, %s3184_s16   ;;  %s2439_s15 = sphi %s2490_s15, %s3183_s15  }
   0x5   : > { %s63_s21 = ssub.s32 %s2451_s18, %s2512_s20  ;;  %s66_s22 = sadd.s32 1, %s2447_s17 }
   0x6   : > { %p64_p0 = scmp.eq.s32.totalorder %s63_s21, 0  ;;  %p73_p1 = scmp.ne.s32.totalorder %s2447_s17, %s2443_s16 }
   0x7   : > { %p74_p2 = scmp.eq.s32.totalorder %s2451_s18, 0  ;;  %p79_p3 = scmp.ne.s32.totalorder %s2443_s16, %s2439_s15 }
   0x8   : > { %s2522_s23 = scalar_select %p64_p0, %s2447_s17, %s66_s22  }
   0x9   : > { %p2524_p4 = por %p74_p2, %p73_p1  ;;  %p3158_p5 = scmp.eq.s32.totalorder %s2509_s19, 0 }
   0xa   : > { %p1611_p6 = scmp.ge.s32.totalorder %s2451_s18, 1  ;;  %p137_p7 = scmp.lt.s32.totalorder %s2451_s18, 4 }
   0xb   : > { %p2533_p8 = por %p3158_p5, %p79_p3  ;;  %s2453_s27 = smov [#allocation2]  }
   0xc   : > { %p2538_p10 = pnand %p1611_p6, %p137_p7  ;;  %s149_s28 = sshll.u32 %s2453_s27, 4  ;;  %s150_s28 = int_to_ptr.vmem [resolvable:$true] %s149_s28 }
   0xd   : > { %s3166_s25 = scalar_select %p2533_p8, 1, 0 }
   0xe   : > { %s3167_s26 = scalar_select %p2538_p10, 1, 0 }
   0xf   : > { %p2104_p11 = pneg %p2538_p10  ;;  %p2120_p13 = scmp.lt.s32.totalorder %s2451_s18, 3 }
  0x10   : > { %s2263_s7 = scalar_lea.hbm %s3153_s0, 2048 }
  0x11   : > { %p2546_p12 = pnand %p2104_p11, %p3158_p5  ;;  %p2553_p0 = pnand %p2120_p13, %p2524_p4 }
  0x12   : > { %p2264_p1 = scmp.ne.s32.totalorder %s3153_s0, %s2263_s7  ;;  %p2270_p4 = scmp.lt.u32.totalorder %s2263_s7, %s3153_s0 }
  0x13   : > { %s3169_s30 = scalar_select %p2553_p0, 1, 0 }
  0x14   : > { %p3162_p2 = pneg %p2546_p12 }
  0x16   : > { %p2266_p3 = pnand %p3162_p2, %p2264_p1 }
  0x18   : > { %p2267_p6 = pneg %p2266_p3 }
  0x1a   : > { %p2272_p7 = pnand %p2270_p4, %p2267_p6 }
  0x1c   : > { %2275 = shalt.err (!%p2272_p7)
}
  0x1d   : > { %s2276_s12 = scalar_lea.vmem %s150_s28, 2048  ;;  %p2284_p5 = scmp.lt.s32.totalorder %s150_s28, %s150_s28 }
  0x1e   : > { %p2277_p11 = scmp.ne.s32.totalorder %s150_s28, %s2276_s12  ;;  %p2285_p8 = scmp.lt.s32.totalorder %s2276_s12, %s2276_s12 }
  0x20   : > { %p2279_p13 = pnand %p2277_p11, %p3162_p2  ;;  %p2286_p10 = por %p2285_p8, %p2284_p5 }
  0x22   : > { %p2280_p9 = pneg %p2279_p13 }
  0x24   : > { %p2287_p0 = pnand %p2286_p10, %p2280_p9 }
  0x26   : > { %2290 = shalt.err (!%p2287_p0)
}
  0x27   : > { %s2454_s13 = smov 128   ;;  %s2455_s14 = smov 8  }
  0x28   : > { %2107 = dma.hbm_to_vmem [thread:$0]  (!%p2546_p12), %s3153_s0, 2048, %s150_s28, [#allocation3], %s2454_s13, %s2454_s13, %s2455_s14  }
  0x29   : > { %s176_s22 = sand.u32 1, %s2451_s18   ;;  %s178_s24 = sand.u32 1, %s2447_s17  }
  0x2a   : > { %s1615_s27 = sshll.u32 %s178_s24, 8  ;;  %s1728_s5 = sshll.u32 %s2451_s18, 12 }
  0x2b   : > { %s2587_s8 = scalar_lea.hbm %s3155_s2, %s1728_s5  ;;  %s180_s9 = scalar_lea.vmem [#allocation7], %s1615_s27 }
  0x2c   : > { %s187_s10 = sshll.u32 %s180_s9, 4  ;;  %s2456_s11 = smov [#allocation5]   ;;  %s2589_s10 = int_to_ptr.vmem [resolvable:$true] %s187_s10 }
  0x2d   : > { %s2591_s28 = sshll.u32 %s2456_s11, 4  ;;  %s2593_s12 = scalar_lea.sflag [#allocation3], %s176_s22  ;;  %s163_s28 = int_to_ptr.vmem [resolvable:$true] %s2591_s28 }
  0x2e   : > { %s2291_s13 = scalar_lea.hbm %s2587_s8, 4096  ;;  %p3170_p8 = scmp.ne.s32.totalorder %s3169_s30, 0 }
  0x2f   : > { %p2292_p5 = scmp.ne.s32.totalorder %s2587_s8, %s2291_s13  ;;  %s2296_s21 = scalar_lea.hbm %s3155_s2, 12288 }
  0x30   : > { %p3163_p9 = pneg %p3170_p8  ;;  %p2297_p1 = scmp.lt.u32.totalorder %s2587_s8, %s3155_s2 }
  0x31   : > { %p2298_p3 = scmp.lt.u32.totalorder %s2296_s21, %s2291_s13  ;;  %p2300_p4 = scmp.lt.u32.totalorder %s2291_s13, %s2587_s8 }
  0x32   : > { %p2294_p10 = pnand %p3163_p9, %p2292_p5 }
  0x33   : > { %p2299_p6 = por %p2298_p3, %p2297_p1 }
  0x34   : > { %p2295_p0 = pneg %p2294_p10 }
  0x35   : > { %p2301_p7 = por %p2300_p4, %p2299_p6 }
  0x37   : > { %p2302_p11 = pnand %p2301_p7, %p2295_p0 }
  0x39   : > { %2305 = shalt.err (!%p2302_p11)
}
  0x3a   : > { %s2306_s22 = scalar_lea.vmem %s2589_s10, 4096  ;;  %s2457_s6 = smov [#allocation7]  }
  0x3b   : > { %p2307_p13 = scmp.ne.s32.totalorder %s2589_s10, %s2306_s22  ;;  %s2311_s7 = sshll.u32 %s2457_s6, 4  ;;  %s2312_s7 = int_to_ptr.vmem [resolvable:$false] %s2311_s7 }
  0x3c   : > { %s2313_s9 = scalar_lea.vmem %s2312_s7, 8192  ;;  %p2314_p2 = scmp.lt.s32.totalorder %s2589_s10, %s2312_s7 }
  0x3d   : > { %p2309_p5 = pnand %p2307_p13, %p3163_p9  ;;  %p2315_p1 = scmp.lt.s32.totalorder %s2313_s9, %s2306_s22 }
  0x3f   : > { %p2310_p10 = pneg %p2309_p5  ;;  %p2316_p3 = por %p2315_p1, %p2314_p2 }
  0x41   : > { %p2317_p6 = pnand %p2316_p3, %p2310_p10 }
  0x43   : > { %2320 = shalt.err (!%p2317_p6)
}
  0x44   : > { %s2458_s11 = smov 64   ;;  %s2459_s13 = smov 4  }
  0x45   : > { %2114 = dma.hbm_to_vmem [thread:$0]  (!%p3170_p8), %s2587_s8, 4096, %s2589_s10, %s2593_s12, %s2458_s11, %s2458_s11, %s2459_s13  }
  0x46   : > { %s1618_s14 = sshll.u32 %s178_s24, 3  ;;  %s2321_s27 = scalar_lea.hbm %s3154_s1, 1024 }
  0x47   : > { %p2322_p2 = scmp.ne.s32.totalorder %s3154_s1, %s2321_s27  ;;  %p3171_p0 = pneg %p2546_p12 }
  0x48   : > { %p2328_p11 = scmp.lt.u32.totalorder %s2321_s27, %s3154_s1 }
  0x49   : > { %p2324_p4 = pnand %p2322_p2, %p3171_p0 }
  0x4b   : > { %p2325_p7 = pneg %p2324_p4 }
  0x4d   : > { %p2330_p13 = pnand %p2328_p11, %p2325_p7 }
  0x4f   : > { %2333 = shalt.err (!%p2330_p13)
}
  0x50   : > { %s2334_s8 = scalar_lea.vmem %s163_s28, 1024  ;;  %p3172_p10 = pmov %p3171_p0 }
  0x51   : > { %p2335_p5 = scmp.ne.s32.totalorder %s163_s28, %s2334_s8  ;;  %p2342_p6 = scmp.lt.s32.totalorder %s163_s28, %s163_s28 }
  0x52   : > { %p2343_p9 = scmp.lt.s32.totalorder %s2334_s8, %s2334_s8 }
  0x53   : > { %p2337_p1 = pnand %p2335_p5, %p3172_p10 }
  0x54   : > { %p2344_p8 = por %p2343_p9, %p2342_p6 }
  0x55   : > { %p2338_p3 = pneg %p2337_p1 }
  0x57   : > { %p2345_p0 = pnand %p2344_p8, %p2338_p3 }
  0x59   : > { %2348 = shalt.err (!%p2345_p0)
}
  0x5a   : > { %2110 = dma.hbm_to_vmem [thread:$0]  (!%p2546_p12), %s3154_s1, 1024, %s163_s28, [#allocation6], %s2458_s11, %s2458_s11, %s2459_s13  }
  0x5b   : > { %s1619_s9 = sshll.u32 %s2451_s18, 7  ;;  %s201_s5 = scalar_lea.vmem [#allocation8], %s1618_s14 }
  0x5c   : > { %s2648_s27 = scalar_lea.hbm %s3156_s3, %s1619_s9  ;;  %s208_s22 = sshll.u32 %s201_s5, 4  ;;  %s209_s22 = int_to_ptr.vmem [resolvable:$true] %s208_s22 }
  0x5d   : > { %s2349_s29 = scalar_lea.hbm %s2648_s27, 128  ;;  %p3173_p9 = scmp.ne.s32.totalorder %s3169_s30, 0 }
  0x5e   : > { %p2350_p8 = scmp.ne.s32.totalorder %s2648_s27, %s2349_s29  ;;  %s2354_s11 = scalar_lea.hbm %s3156_s3, 384 }
  0x5f   : > { %p3174_p2 = pneg %p3173_p9  ;;  %p2355_p12 = scmp.lt.u32.totalorder %s2648_s27, %s3156_s3 }
  0x60   : > { %p2356_p11 = scmp.lt.u32.totalorder %s2354_s11, %s2349_s29  ;;  %p2358_p5 = scmp.lt.u32.totalorder %s2349_s29, %s2648_s27 }
  0x61   : > { %p2352_p4 = pnand %p2350_p8, %p3174_p2 }
  0x62   : > { %p2357_p13 = por %p2356_p11, %p2355_p12 }
  0x63   : > { %p2353_p7 = pneg %p2352_p4 }
  0x64   : > { %p2359_p10 = por %p2358_p5, %p2357_p13 }
  0x66   : > { %p2360_p1 = pnand %p2359_p10, %p2353_p7 }
  0x68   : > { %2363 = shalt.err (!%p2360_p1)
}
  0x69   : > { %s2364_s14 = scalar_lea.vmem %s209_s22, 128  ;;  %p3175_p6 = pmov %p3174_p2 }
  0x6a   : > { %p2365_p3 = scmp.ne.s32.totalorder %s209_s22, %s2364_s14  ;;  %s2460_s7 = smov [#allocation8]  }
  0x6b   : > { %s2369_s8 = sshll.u32 %s2460_s7, 4  ;;  %s2370_s8 = int_to_ptr.vmem [resolvable:$false] %s2369_s8 }
  0x6c   : > { %p2367_p0 = pnand %p2365_p3, %p3175_p6  ;;  %s2371_s24 = scalar_lea.vmem %s2370_s8, 256 }
  0x6d   : > { %p2372_p2 = scmp.lt.s32.totalorder %s209_s22, %s2370_s8  ;;  %p2373_p4 = scmp.lt.s32.totalorder %s2371_s24, %s2364_s14 }
  0x6e   : > { %p2368_p8 = pneg %p2367_p0 }
  0x6f   : > { %p2374_p11 = por %p2373_p4, %p2372_p2 }
  0x71   : > { %p2375_p12 = pnand %p2374_p11, %p2368_p8 }
  0x73   : > { %2378 = shalt.err (!%p2375_p12)
}
  0x74   : > { %2117 = dma.hbm_to_vmem [thread:$0]  (!%p3173_p9), %s2648_s27, 128, %s209_s22, %s2593_s12  }
  0x75   : > { %p3176_p7 = scmp.ne.s32.totalorder %s3167_s26, 0 }
  0x76   : > { %p3177_p13 = scmp.eq.s32.totalorder (!%p3176_p7), %s2509_s19, 0 }
  0x77   : > { %217 = sbr.rel (%p3176_p7) target bundleno = 1280 (0x500), region = 36 }
  0x7e   : > { %2422 = dma.done.wait (%p3177_p13), [#allocation3], 2048   ;;  %p3178_p5 = pmov %p3177_p13 }
  0x80   : > { %2424 = vsyncadd (%p3178_p5), [#allocation3], 4294965248  ;;  %p3179_p10 = pmov %p3178_p5 }
  0x81   : > { %p3180_p1 = pmov %p3178_p5 }
  0x82   : > { %2426 = dma.done.wait (%p3179_p10), [#allocation6], 1024  }
  0x83   : > { %2428 = vsyncadd (%p3180_p1), [#allocation6], 4294966272  ;;  %s227_s30 = sand.u32 1, %s2509_s19   ;;  %s229_s12 = sand.u32 1, %s2443_s16  }
  0x84   : > { %s1623_s10 = sshll.u32 %s229_s12, 8  ;;  %s228_s26 = scalar_lea.sflag [#allocation3], %s227_s30 }
  0x85   : > { %s2682_s9 = scalar_lea.vmem [#allocation7], %s1623_s10  ;;  %p3181_p9 = scmp.ne.s32.totalorder %s3166_s25, 0 }
  0x87   : > { %2430 = dma.done.wait (%p3181_p9), %s228_s26, 4224  }
  0x88   : > { %2432 = vsyncadd (%p3181_p9), %s228_s26, 4294963072  ;;  %s2688_s15 = sshll.u32 %s229_s12, 3  ;;  %p3182_p3 = scmp.ne.s32.totalorder %s2509_s19, 0 }
  0x89   : > { %s240_s21 = scalar_lea.vmem [#allocation8], %s2688_s15  ;;  %v270_v0 = vld [vmem:[#allocation2] sm:$0xff] (!%p3182_p3)  ;;  %v271_v1 = vld [vmem:[#allocation2 + $0x8] sm:$0xff] (!%p3182_p3)  ;;  %v272_v2 = vld [vmem:[#allocation2 + $0x10] sm:$0xff] (!%p3182_p3) }
  0x8a   : > { %269 = sbr.rel (%p3182_p3) target bundleno = 146 (0x92), region = 56  ;;  %286 = vst [vmem:[#allocation9] sm:$0xff] (!%p3182_p3), %v270_v0  ;;  %287 = vst [vmem:[#allocation9 + $0x8] sm:$0xff] (!%p3182_p3), %v271_v1  ;;  %v273_v3 = vld [vmem:[#allocation2 + $0x18] sm:$0xff] (!%p3182_p3)  ;;  %v274_v4 = vld [vmem:[#allocation2 + $0x20] sm:$0xff] (!%p3182_p3) }
  0x8b   : > { %288 = vst [vmem:[#allocation9 + $0x10] sm:$0xff] (!%p3182_p3), %v272_v2  ;;  %v275_v5 = vld [vmem:[#allocation2 + $0x28] sm:$0xff] (!%p3182_p3)  ;;  %289 = vst [vmem:[#allocation9 + $0x18] sm:$0xff] (!%p3182_p3), %v273_v3  ;;  %v276_v6 = vld [vmem:[#allocation2 + $0x30] sm:$0xff] (!%p3182_p3) }
  0x8c   : > { %290 = vst [vmem:[#allocation9 + $0x20] sm:$0xff] (!%p3182_p3), %v274_v4  ;;  %291 = vst [vmem:[#allocation9 + $0x28] sm:$0xff] (!%p3182_p3), %v275_v5  ;;  %v277_v7 = vld [vmem:[#allocation2 + $0x38] sm:$0xff] (!%p3182_p3)  ;;  %v278_v8 = vld [vmem:[#allocation2 + $0x40] sm:$0xff] (!%p3182_p3) }
  0x8d   : > { %292 = vst [vmem:[#allocation9 + $0x30] sm:$0xff] (!%p3182_p3), %v276_v6  ;;  %293 = vst [vmem:[#allocation9 + $0x38] sm:$0xff] (!%p3182_p3), %v277_v7  ;;  %v279_v9 = vld [vmem:[#allocation2 + $0x48] sm:$0xff] (!%p3182_p3)  ;;  %v280_v10 = vld [vmem:[#allocation2 + $0x50] sm:$0xff] (!%p3182_p3) }
  0x8e   : > { %294 = vst [vmem:[#allocation9 + $0x40] sm:$0xff] (!%p3182_p3), %v278_v8  ;;  %v281_v11 = vld [vmem:[#allocation2 + $0x58] sm:$0xff] (!%p3182_p3)  ;;  %295 = vst [vmem:[#allocation9 + $0x48] sm:$0xff] (!%p3182_p3), %v279_v9  ;;  %v282_v12 = vld [vmem:[#allocation2 + $0x60] sm:$0xff] (!%p3182_p3) }
  0x8f   : > { %296 = vst [vmem:[#allocation9 + $0x50] sm:$0xff] (!%p3182_p3), %v280_v10  ;;  %297 = vst [vmem:[#allocation9 + $0x58] sm:$0xff] (!%p3182_p3), %v281_v11  ;;  %v283_v13 = vld [vmem:[#allocation2 + $0x68] sm:$0xff] (!%p3182_p3)  ;;  %v284_v14 = vld [vmem:[#allocation2 + $0x70] sm:$0xff] (!%p3182_p3) }
  0x90   : > { %298 = vst [vmem:[#allocation9 + $0x60] sm:$0xff] (!%p3182_p3), %v282_v12  ;;  %299 = vst [vmem:[#allocation9 + $0x68] sm:$0xff] (!%p3182_p3), %v283_v13  ;;  %v285_v15 = vld [vmem:[#allocation2 + $0x78] sm:$0xff] (!%p3182_p3) }
  0x91   : > { %300 = vst [vmem:[#allocation9 + $0x70] sm:$0xff] %v284_v14  ;;  %301 = vst [vmem:[#allocation9 + $0x78] sm:$0xff] %v285_v15 }
  0x92 PF: > { %v2167_v16 = vld [vmem:[%s2682_s9 + $0x40] sm:$0xff]   ;;  %v2168_v17 = vld [vmem:[%s2682_s9 + $0x48] sm:$0xff]   ;;  %v2169_v18 = vld [vmem:[%s2682_s9 + $0x50] sm:$0xff]   ;;  %v394_v6 = vlaneseq  ;;  %p1722_p6 = scmp.eq.s32.totalorder %s2509_s19, 2 }
  0x93   : > { %1896 = vmatprep.subr.bf16.mxu1 %v2167_v16  ;;  %v2170_v19 = vld [vmem:[%s2682_s9 + $0x58] sm:$0xff]   ;;  %v302_v20 = vld [vmem:[#allocation9] sm:$0xff]  ;;  %v2175_v23 = vld [vmem:[%s2682_s9] sm:$0xff]  }
  0x94   : > { %1897 = vmatpush3.bf16.msra.mxu1 %v2167_v16  ;;  %v303_v21 = vld [vmem:[#allocation9 + $0x8] sm:$0xff]  ;;  %v2171_v24 = vld [vmem:[%s2682_s9 + $0x60] sm:$0xff]   ;;  %1864 = vmatprep.subr.bf16.mxu0 %v2175_v23  ;;  %v2176_v25 = vld [vmem:[%s2682_s9 + $0x8] sm:$0xff]   ;;  %v2765_v8 = vshrl.u32 %v394_v6, 7 }
  0x95   : > { %1898 = vmatprep.subr.bf16.mxu1 %v2168_v17  ;;  %v2697_v22 = vpack.c.bf16 %v303_v21, %v302_v20  ;;  %1865 = vmatpush3.bf16.msra.mxu0 %v2175_v23  ;;  %v2177_v26 = vld [vmem:[%s2682_s9 + $0x10] sm:$0xff]   ;;  %v2172_v27 = vld [vmem:[%s2682_s9 + $0x68] sm:$0xff]   ;;  %v2178_v28 = vld [vmem:[%s2682_s9 + $0x18] sm:$0xff]  }
  0x96   : > { %1866 = vmatprep.subr.bf16.mxu0 %v2176_v25  ;;  %v2173_v29 = vld [vmem:[%s2682_s9 + $0x70] sm:$0xff]   ;;  %v2179_v30 = vld [vmem:[%s2682_s9 + $0x20] sm:$0xff]   ;;  %v2174_v31 = vld [vmem:[%s2682_s9 + $0x78] sm:$0xff]   ;;  %v545_v10 = vsub.s32 1, %v2765_v8  ;;  %v396_v21 = vsub.s32 0, %v2765_v8 }
  0x97   : > { %1912 = vmatprep.mubr.bf16.mxu1 %v2697_v22  ;;  %1880 = vmatprep.mubr.bf16.mxu0 %v2697_v22  ;;  %v304_v32 = vld [vmem:[#allocation9 + $0x10] sm:$0xff]  ;;  %v305_v33 = vld [vmem:[#allocation9 + $0x18] sm:$0xff]  ;;  %v306_v34 = vld [vmem:[#allocation9 + $0x20] sm:$0xff] }
  0x98   : > { %1899 = vmatpush3.bf16.msra.mxu1 %v2168_v17  ;;  %v2180_v35 = vld [vmem:[%s2682_s9 + $0x28] sm:$0xff]   ;;  %v307_v36 = vld [vmem:[#allocation9 + $0x28] sm:$0xff]  ;;  %v2181_v37 = vld [vmem:[%s2682_s9 + $0x30] sm:$0xff]   ;;  %v2712_v38 = vpack.c.bf16 %v305_v33, %v304_v32 }
  0x99   : > { %1900 = vmatprep.subr.bf16.mxu1 %v2169_v18  ;;  %1867 = vmatpush3.bf16.msra.mxu0 %v2176_v25  ;;  %v2714_v39 = vpack.c.bf16 %v307_v36, %v306_v34  ;;  %v308_v40 = vld [vmem:[#allocation9 + $0x30] sm:$0xff]  ;;  %v309_v41 = vld [vmem:[#allocation9 + $0x38] sm:$0xff]  ;;  %v2182_v42 = vld [vmem:[%s2682_s9 + $0x38] sm:$0xff]  }
  0x9a   : > { %1868 = vmatprep.subr.bf16.mxu0 %v2177_v26  ;;  %v310_v43 = vld [vmem:[#allocation9 + $0x40] sm:$0xff]  ;;  %v311_v44 = vld [vmem:[#allocation9 + $0x48] sm:$0xff]  ;;  %v2719_v45 = vpack.c.bf16 %v309_v41, %v308_v40  ;;  %v2183_v47 = vld [vmem:[%s2682_s9 + $0x80] sm:$0xff]  }
  0x9b   : > { %v2721_v46 = vpack.c.bf16 %v311_v44, %v310_v43  ;;  %v312_v48 = vld [vmem:[#allocation9 + $0x50] sm:$0xff]  ;;  %v313_v49 = vld [vmem:[#allocation9 + $0x58] sm:$0xff]  ;;  %v314_v51 = vld [vmem:[#allocation9 + $0x60] sm:$0xff] }
  0x9c   : > { %1901 = vmatpush3.bf16.msra.mxu1 %v2169_v18  ;;  %v2184_v50 = vld [vmem:[%s2682_s9 + $0x88] sm:$0xff]   ;;  %v315_v52 = vld [vmem:[#allocation9 + $0x68] sm:$0xff]  ;;  %v2728_v53 = vpack.c.bf16 %v313_v49, %v312_v48  ;;  %v2185_v55 = vld [vmem:[%s2682_s9 + $0x90] sm:$0xff]  }
  0x9d   : > { %1902 = vmatprep.subr.bf16.mxu1 %v2170_v19  ;;  %1869 = vmatpush3.bf16.msra.mxu0 %v2177_v26  ;;  %v2731_v54 = vpack.c.bf16 %v315_v52, %v314_v51  ;;  %v316_v56 = vld [vmem:[#allocation9 + $0x70] sm:$0xff]  ;;  %v317_v57 = vld [vmem:[#allocation9 + $0x78] sm:$0xff]  ;;  %v2186_v58 = vld [vmem:[%s2682_s9 + $0x98] sm:$0xff]  }
  0x9e   : > { %1870 = vmatprep.subr.bf16.mxu0 %v2178_v28  ;;  %v2738_v59 = vpack.c.bf16 %v317_v57, %v316_v56  ;;  %v2187_v60 = vld [vmem:[%s2682_s9 + $0xa0] sm:$0xff]   ;;  %v2188_v61 = vld [vmem:[%s2682_s9 + $0xa8] sm:$0xff]   ;;  %v2189_v62 = vld [vmem:[%s2682_s9 + $0xb0] sm:$0xff]  }
  0x9f   : > { %v2190_v63 = vld [vmem:[%s2682_s9 + $0xb8] sm:$0xff]   ;;  %v2191_v0 = vld [vmem:[%s2682_s9 + $0xc0] sm:$0xff]   ;;  %v2192_v1 = vld [vmem:[%s2682_s9 + $0xc8] sm:$0xff]  }
  0xa0   : > { %1903 = vmatpush3.bf16.msra.mxu1 %v2170_v19  ;;  %v2193_v2 = vld [vmem:[%s2682_s9 + $0xd0] sm:$0xff]   ;;  %v2194_v3 = vld [vmem:[%s2682_s9 + $0xd8] sm:$0xff]   ;;  %v2195_v4 = vld [vmem:[%s2682_s9 + $0xe0] sm:$0xff]  }
  0xa1   : > { %1904 = vmatprep.subr.bf16.mxu1 %v2171_v24  ;;  %1871 = vmatpush3.bf16.msra.mxu0 %v2178_v28  ;;  %v2196_v5 = vld [vmem:[%s2682_s9 + $0xe8] sm:$0xff]   ;;  %v2197_v7 = vld [vmem:[%s2682_s9 + $0xf0] sm:$0xff]   ;;  %v2198_v9 = vld [vmem:[%s2682_s9 + $0xf8] sm:$0xff]  }
  0xa2   : > { %1872 = vmatprep.subr.bf16.mxu0 %v2179_v30  ;;  %v2771_v11 = vld [vmem:[%s240_s21] sm:$0xff] }
  0xa3   : > { %v2774_v12 = vrot.slane %v2771_v11, %v545_v10  ;;  %v2784_v25 = vrot.slane %v2771_v11, %v396_v21 }
  0xa4   : > { %1905 = vmatpush3.bf16.msra.mxu1 %v2171_v24 }
  0xa5   : > { %1906 = vmatprep.subr.bf16.mxu1 %v2172_v27  ;;  %1873 = vmatpush3.bf16.msra.mxu0 %v2179_v30 }
  0xa6   : > { %1874 = vmatprep.subr.bf16.mxu0 %v2180_v35 }
  0xa8   : > { %1907 = vmatpush3.bf16.msra.mxu1 %v2172_v27 }
  0xa9   : > { %1908 = vmatprep.subr.bf16.mxu1 %v2173_v29  ;;  %1875 = vmatpush3.bf16.msra.mxu0 %v2180_v35 }
  0xaa   : > { %1876 = vmatprep.subr.bf16.mxu0 %v2181_v37 }
  0xac   : > { %1909 = vmatpush3.bf16.msra.mxu1 %v2173_v29 }
  0xad   : > { %1910 = vmatprep.subr.bf16.mxu1 %v2174_v31  ;;  %1877 = vmatpush3.bf16.msra.mxu0 %v2181_v37 }
  0xae   : > { %1878 = vmatprep.subr.bf16.mxu0 %v2182_v42 }
  0xb0   : > { %1911 = vmatpush3.bf16.msra.mxu1 %v2174_v31 }
  0xb1   : > { %1879 = vmatpush3.bf16.msra.mxu0 %v2182_v42  ;;  %1960 = vmatprep.subr.bf16.mxu1 %v2191_v0 }
  0xb2   : > { %1928 = vmatprep.subr.bf16.mxu0 %v2183_v47 }
  0xb3   : > { %1913 = vmatmul.mubr.bf16.vlgmr.msra.gmra.mrb[0].mxu1 %v2712_v38 }
  0xb4   : > { %1916 = vmatprep.mubr.bf16.mxu1 %v2714_v39  ;;  %1881 = vmatmul.mubr.bf16.vlgmr.msra.gmra.mrb[0].mxu0 %v2712_v38 }
  0xb5   : > { %1884 = vmatprep.mubr.bf16.mxu0 %v2714_v39  ;;  %1929 = vmatpush3.bf16.msra.mxu0 %v2183_v47 }
  0xb6   : > { %1930 = vmatprep.subr.bf16.mxu0 %v2184_v50  ;;  %1961 = vmatpush3.bf16.msra.mxu1 %v2191_v0 }
  0xb7   : > { %1962 = vmatprep.subr.bf16.mxu1 %v2192_v1 }
  0xb9   : > { %1931 = vmatpush3.bf16.msra.mxu0 %v2184_v50 }
  0xba   : > { %1932 = vmatprep.subr.bf16.mxu0 %v2185_v55  ;;  %1963 = vmatpush3.bf16.msra.mxu1 %v2192_v1 }
  0xbb   : > { %1917 = vmatmul.mubr.bf16.gmra.mrb[4].mxu1 %v2719_v45  ;;  %1964 = vmatprep.subr.bf16.mxu1 %v2193_v2 }
  0xbc   : > { %1920 = vmatprep.mubr.bf16.mxu1 %v2721_v46  ;;  %1885 = vmatmul.mubr.bf16.gmra.mrb[4].mxu0 %v2719_v45 }
  0xbd   : > { %1888 = vmatprep.mubr.bf16.mxu0 %v2721_v46  ;;  %1933 = vmatpush3.bf16.msra.mxu0 %v2185_v55 }
  0xbe   : > { %1934 = vmatprep.subr.bf16.mxu0 %v2186_v58  ;;  %1965 = vmatpush3.bf16.msra.mxu1 %v2193_v2 }
  0xbf   : > { %1966 = vmatprep.subr.bf16.mxu1 %v2194_v3 }
  0xc1   : > { %1935 = vmatpush3.bf16.msra.mxu0 %v2186_v58 }
  0xc2   : > { %1936 = vmatprep.subr.bf16.mxu0 %v2187_v60  ;;  %1967 = vmatpush3.bf16.msra.mxu1 %v2194_v3 }
  0xc3   : > { %1921 = vmatmul.mubr.bf16.gmra.mrb[8].mxu1 %v2728_v53  ;;  %1968 = vmatprep.subr.bf16.mxu1 %v2195_v4 }
  0xc4   : > { %1924 = vmatprep.mubr.bf16.mxu1 %v2731_v54  ;;  %1889 = vmatmul.mubr.bf16.gmra.mrb[8].mxu0 %v2728_v53 }
  0xc5   : > { %1892 = vmatprep.mubr.bf16.mxu0 %v2731_v54  ;;  %1937 = vmatpush3.bf16.msra.mxu0 %v2187_v60 }
  0xc6   : > { %1938 = vmatprep.subr.bf16.mxu0 %v2188_v61  ;;  %1969 = vmatpush3.bf16.msra.mxu1 %v2195_v4 }
  0xc7   : > { %1970 = vmatprep.subr.bf16.mxu1 %v2196_v5 }
  0xc9   : > { %1939 = vmatpush3.bf16.msra.mxu0 %v2188_v61 }
  0xca   : > { %1940 = vmatprep.subr.bf16.mxu0 %v2189_v62  ;;  %1971 = vmatpush3.bf16.msra.mxu1 %v2196_v5 }
  0xcb   : > { %1925 = vmatmul.mubr.bf16.gmra.mrb[12].mxu1 %v2738_v59  ;;  %1972 = vmatprep.subr.bf16.mxu1 %v2197_v7 }
  0xcc   : > { %1976 = vmatprep.mubr.bf16.mxu1 %v2697_v22  ;;  %1893 = vmatmul.mubr.bf16.gmra.mrb[12].mxu0 %v2738_v59 }
  0xcd   : > { %1941 = vmatpush3.bf16.msra.mxu0 %v2189_v62  ;;  %1944 = vmatprep.mubr.bf16.mxu0 %v2697_v22 }
  0xce   : > { %1942 = vmatprep.subr.bf16.mxu0 %v2190_v63  ;;  %1973 = vmatpush3.bf16.msra.mxu1 %v2197_v7 }
  0xcf   : > { %1974 = vmatprep.subr.bf16.mxu1 %v2198_v9 }
  0xd1   : > { %1943 = vmatpush3.bf16.msra.mxu0 %v2190_v63 }
  0xd2   : > { %1975 = vmatpush3.bf16.msra.mxu1 %v2198_v9 }
  0xd4   : > { %1945 = vmatmul.mubr.bf16.vlgmr.msra.gmra.mrb[16].mxu0 %v2712_v38 }
  0xd5   : > { %1948 = vmatprep.mubr.bf16.mxu0 %v2714_v39  ;;  %1977 = vmatmul.mubr.bf16.vlgmr.msra.gmra.mrb[16].mxu1 %v2712_v38 }
  0xd6   : > { %1980 = vmatprep.mubr.bf16.mxu1 %v2714_v39 }
  0xdc   : > { %1949 = vmatmul.mubr.bf16.gmra.mrb[20].mxu0 %v2719_v45 }
  0xdd   : > { %1952 = vmatprep.mubr.bf16.mxu0 %v2721_v46  ;;  %1981 = vmatmul.mubr.bf16.gmra.mrb[20].mxu1 %v2719_v45 }
  0xde   : > { %1984 = vmatprep.mubr.bf16.mxu1 %v2721_v46 }
  0xe4   : > { %1953 = vmatmul.mubr.bf16.gmra.mrb[24].mxu0 %v2728_v53 }
  0xe5   : > { %1956 = vmatprep.mubr.bf16.mxu0 %v2731_v54  ;;  %1985 = vmatmul.mubr.bf16.gmra.mrb[24].mxu1 %v2728_v53 }
  0xe6   : > { %1988 = vmatprep.mubr.bf16.mxu1 %v2731_v54 }
  0xec   : > { %1957 = vmatmul.mubr.bf16.gmra.mrb[28].mxu0 %v2738_v59 }
  0xed   : > { %1989 = vmatmul.mubr.bf16.gmra.mrb[28].mxu1 %v2738_v59 }
 0x186   : > { %v1914_v13 = vpop.f32.mrb[0].mxu1 }
 0x187   : > { %v629_v14 = vpop.f32.mrb[1].mxu1  ;;  %v638_v16 = vadd.f32 %v1914_v13, %v2774_v12  ;;  %v1882_v32 = vpop.f32.mrb[0].mxu0 }
 0x188   : > { %v1915_v15 = vpop.f32.mrb[2].mxu1  ;;  %v630_v19 = vadd.f32 %v629_v14, %v2774_v12  ;;  %v2793_v34 = vadd.f32 %v1882_v32, %v2784_v25  ;;  %v480_v35 = vpop.f32.mrb[1].mxu0 }
 0x189   : > { %v641_v17 = vadd.f32 %v1915_v15, %v2774_v12  ;;  %v632_v18 = vpop.f32.mrb[3].mxu1  ;;  %v481_v37 = vadd.f32 %v480_v35, %v2784_v25  ;;  %v1883_v38 = vpop.f32.mrb[2].mxu0 }
 0x18a   : > { %v633_v20 = vadd.f32 %v632_v18, %v2774_v12  ;;  %v2797_v40 = vadd.f32 %v1883_v38, %v2784_v25  ;;  %v483_v41 = vpop.f32.mrb[3].mxu0 }
 0x18b   : > { %v999_v22 = vpack.c.bf16 %v641_v17, %v638_v16  ;;  %v484_v42 = vadd.f32 %v483_v41, %v2784_v25 }
 0x18c   : > { %v998_v23 = vpack.c.bf16 %v633_v20, %v630_v19  ;;  %v991_v44 = vpack.c.bf16 %v2797_v40, %v2793_v34  ;;  %v1761_v34 = vld [vmem:[#allocation5 + $0x8] sm:$0xff]   ;;  %v1730_v40 = vld [vmem:[#allocation5] sm:$0xff]  }
 0x18d   : > { %v990_v47 = vpack.c.bf16 %v484_v42, %v481_v37 }
 0x18e   : > { %1992 = vmatprep.subr.bf16.mxu0 %v998_v23  ;;  %v1918_v24 = vpop.f32.mrb[4].mxu1 }
 0x18f   : > { %1993 = vmatpush3.bf16.xpose.msra.mxu0 %v998_v23  ;;  %v654_v26 = vadd.f32 %v1918_v24, %v2774_v12  ;;  %v645_v27 = vpop.f32.mrb[5].mxu1  ;;  %2008 = vmatprep.mubr.bf16.mxu0 %v990_v47  ;;  %v1886_v52 = vpop.f32.mrb[4].mxu0 }
 0x190   : > { %1994 = vmatprep.subr.bf16.mxu0 %v999_v22  ;;  %v646_v28 = vadd.f32 %v645_v27, %v2774_v12  ;;  %v1919_v29 = vpop.f32.mrb[6].mxu1  ;;  %v2809_v56 = vadd.f32 %v1886_v52, %v2784_v25  ;;  %v496_v57 = vpop.f32.mrb[5].mxu0 }
 0x191   : > { %v657_v30 = vadd.f32 %v1919_v29, %v2774_v12  ;;  %v648_v31 = vpop.f32.mrb[7].mxu1  ;;  %v2812_v60 = vadd.f32 %v496_v57, %v2784_v25  ;;  %v1887_v61 = vpop.f32.mrb[6].mxu0  ;;  %v694_v29 = vsub.s32 2, %v2765_v8 }
 0x192   : > { %v649_v33 = vadd.f32 %v648_v31, %v2774_v12  ;;  %v2815_v53 = vadd.f32 %v1887_v61, %v2784_v25  ;;  %v499_v63 = vpop.f32.mrb[7].mxu0 }
 0x193   : > { %v1001_v36 = vpack.c.bf16 %v657_v30, %v654_v26  ;;  %v2818_v0 = vadd.f32 %v499_v63, %v2784_v25 }
 0x194   : > { %v1000_v39 = vpack.c.bf16 %v649_v33, %v646_v28  ;;  %v993_v1 = vpack.c.bf16 %v2815_v53, %v2809_v56  ;;  %v1731_v56 = vunpack.c.l.bf16 %v1730_v40 }
 0x195   : > { %v992_v4 = vpack.c.bf16 %v2818_v0, %v2812_v60 }
 0x196   : > { %v1922_v43 = vpop.f32.mrb[8].mxu1 }
 0x197   : > { %1995 = vmatpush3.bf16.xpose.msra.mxu0 %v999_v22  ;;  %v670_v45 = vadd.f32 %v1922_v43, %v2774_v12  ;;  %v661_v46 = vpop.f32.mrb[9].mxu1  ;;  %v1890_v10 = vpop.f32.mrb[8].mxu0 }
 0x198   : > { %1996 = vmatprep.subr.bf16.mxu0 %v1000_v39  ;;  %v662_v48 = vadd.f32 %v661_v46, %v2774_v12  ;;  %v1923_v49 = vpop.f32.mrb[10].mxu1  ;;  %v2830_v14 = vadd.f32 %v1890_v10, %v2784_v25  ;;  %v512_v15 = vpop.f32.mrb[9].mxu0 }
 0x199   : > { %v673_v50 = vadd.f32 %v1923_v49, %v2774_v12  ;;  %v664_v51 = vpop.f32.mrb[11].mxu1  ;;  %v2835_v17 = vadd.f32 %v512_v15, %v2784_v25  ;;  %v1891_v18 = vpop.f32.mrb[10].mxu0 }
 0x19a   : > { %v665_v55 = vadd.f32 %v664_v51, %v2774_v12  ;;  %v2838_v20 = vadd.f32 %v1891_v18, %v2784_v25  ;;  %v515_v59 = vpop.f32.mrb[11].mxu0 }
 0x19b   : > { %v1003_v58 = vpack.c.bf16 %v673_v50, %v670_v45  ;;  %v2841_v21 = vadd.f32 %v515_v59, %v2784_v25 }
 0x19c   : > { %v1002_v62 = vpack.c.bf16 %v665_v55, %v662_v48 }
 0x19d   : > { %v994_v22 = vpack.c.bf16 %v2841_v21, %v2835_v17  ;;  %v1732_v17 = vunpack.c.h.bf16 %v1730_v40  ;;  %v1762_v21 = vld [vmem:[#allocation5 + $0x10] sm:$0xff]  }
 0x19e   : > { %v1926_v54 = vpop.f32.mrb[12].mxu1 }
 0x19f   : > { %1997 = vmatpush3.bf16.xpose.msra.mxu0 %v1000_v39  ;;  %v686_v2 = vadd.f32 %v1926_v54, %v2774_v12  ;;  %v677_v3 = vpop.f32.mrb[13].mxu1  ;;  %v1894_v23 = vpop.f32.mrb[12].mxu0 }
 0x1a0   : > { %1998 = vmatprep.subr.bf16.mxu0 %v1001_v36  ;;  %v678_v5 = vadd.f32 %v677_v3, %v2774_v12  ;;  %v1927_v6 = vpop.f32.mrb[14].mxu1  ;;  %v2848_v24 = vadd.f32 %v1894_v23, %v2784_v25  ;;  %v528_v26 = vpop.f32.mrb[13].mxu0 }
 0x1a1   : > { %v689_v7 = vadd.f32 %v1927_v6, %v2774_v12  ;;  %v680_v9 = vpop.f32.mrb[15].mxu1  ;;  %v2851_v27 = vadd.f32 %v528_v26, %v2784_v25  ;;  %v1895_v28 = vpop.f32.mrb[14].mxu0 }
 0x1a2   : > { %v681_v13 = vadd.f32 %v680_v9, %v2774_v12  ;;  %v995_v12 = vpack.c.bf16 %v2838_v20, %v2830_v14  ;;  %v2855_v30 = vadd.f32 %v1895_v28, %v2784_v25  ;;  %v531_v31 = vpop.f32.mrb[15].mxu0 }
 0x1a3   : > { %v2832_v16 = vpack.c.bf16 %v689_v7, %v686_v2  ;;  %v2858_v32 = vadd.f32 %v531_v31, %v2784_v25 }
 0x1a4   : > { %v1004_v19 = vpack.c.bf16 %v681_v13, %v678_v5  ;;  %v997_v33 = vpack.c.bf16 %v2855_v30, %v2848_v24  ;;  %v1739_v24 = vunpack.c.l.bf16 %v1762_v21 }
 0x1a5   : > { %v996_v35 = vpack.c.bf16 %v2858_v32, %v2851_v27  ;;  %v1763_v27 = vld [vmem:[#allocation5 + $0x18] sm:$0xff]   ;;  %v1740_v32 = vunpack.c.h.bf16 %v1762_v21 }
 0x1a7   : > { %1999 = vmatpush3.bf16.xpose.msra.mxu0 %v1001_v36  ;;  %v695_v36 = vrot.slane %v2771_v11, %v694_v29  ;;  %v1946_v37 = vpop.f32.mrb[16].mxu0 }
 0x1a8   : > { %2000 = vmatprep.subr.bf16.mxu0 %v1002_v62  ;;  %v778_v39 = vpop.f32.mrb[17].mxu0 }
 0x1a9   : > { %v787_v38 = vadd.f32 %v1946_v37, %v695_v36  ;;  %v779_v41 = vadd.f32 %v778_v39, %v695_v36  ;;  %v1947_v42 = vpop.f32.mrb[18].mxu0  ;;  %v1764_v39 = vld [vmem:[#allocation5 + $0x20] sm:$0xff]  }
 0x1aa   : > { %v790_v43 = vadd.f32 %v1947_v42, %v695_v36  ;;  %v781_v45 = vpop.f32.mrb[19].mxu0 }
 0x1ab   : > { %v782_v46 = vadd.f32 %v781_v45, %v695_v36  ;;  %v1747_v45 = vunpack.c.l.bf16 %v1764_v39 }
 0x1ac   : > { %v1352_v25 = vpack.c.bf16 %v790_v43, %v787_v38 }
 0x1ad   : > { %v1351_v47 = vpack.c.bf16 %v782_v46, %v779_v41  ;;  %v1744_v41 = vunpack.c.h.bf16 %v1763_v27  ;;  %v1765_v46 = vld [vmem:[#allocation5 + $0x28] sm:$0xff]  }
 0x1af   : > { %2001 = vmatpush3.bf16.xpose.msra.mxu0 %v1002_v62  ;;  %2024 = vmatprep.subr.bf16.mxu1 %v1351_v47  ;;  %v1950_v48 = vpop.f32.mrb[20].mxu0 }
 0x1b0   : > { %2002 = vmatprep.subr.bf16.mxu0 %v1003_v58  ;;  %2025 = vmatpush3.bf16.msra.mxu1 %v1351_v47  ;;  %v803_v49 = vadd.f32 %v1950_v48, %v695_v36  ;;  %v794_v50 = vpop.f32.mrb[21].mxu0  ;;  %v1748_v48 = vunpack.c.h.bf16 %v1764_v39 }
 0x1b1   : > { %2026 = vmatprep.subr.bf16.mxu1 %v1352_v25  ;;  %v795_v51 = vadd.f32 %v794_v50, %v695_v36  ;;  %v1951_v52 = vpop.f32.mrb[22].mxu0  ;;  %v1751_v50 = vunpack.c.l.bf16 %v1765_v46 }
 0x1b2   : > { %v806_v55 = vadd.f32 %v1951_v52, %v695_v36  ;;  %v797_v57 = vpop.f32.mrb[23].mxu0 }
 0x1b3   : > { %v798_v61 = vadd.f32 %v797_v57, %v695_v36  ;;  %v1766_v57 = vld [vmem:[#allocation5 + $0x30] sm:$0xff]  }
 0x1b4   : > { %2027 = vmatpush3.bf16.msra.mxu1 %v1352_v25  ;;  %v1354_v62 = vpack.c.bf16 %v806_v55, %v803_v49 }
 0x1b5   : > { %v1353_v63 = vpack.c.bf16 %v798_v61, %v795_v51  ;;  %v1752_v61 = vunpack.c.h.bf16 %v1765_v46 }
 0x1b7   : > { %2003 = vmatpush3.bf16.xpose.msra.mxu0 %v1003_v58  ;;  %v1954_v58 = vpop.f32.mrb[24].mxu0  ;;  %2028 = vmatprep.subr.bf16.mxu1 %v1353_v63 }
 0x1b8   : > { %2004 = vmatprep.subr.bf16.mxu0 %v1004_v19  ;;  %v819_v54 = vadd.f32 %v1954_v58, %v695_v36  ;;  %v810_v2 = vpop.f32.mrb[25].mxu0  ;;  %2029 = vmatpush3.bf16.msra.mxu1 %v1353_v63  ;;  %v1755_v58 = vunpack.c.l.bf16 %v1766_v57 }
 0x1b9   : > { %v811_v3 = vadd.f32 %v810_v2, %v695_v36  ;;  %v1955_v5 = vpop.f32.mrb[26].mxu0  ;;  %2030 = vmatprep.subr.bf16.mxu1 %v1354_v62 }
 0x1ba   : > { %v822_v6 = vadd.f32 %v1955_v5, %v695_v36  ;;  %v813_v7 = vpop.f32.mrb[27].mxu0  ;;  %v1756_v5 = vunpack.c.h.bf16 %v1766_v57 }
 0x1bb   : > { %v814_v9 = vadd.f32 %v813_v7, %v695_v36 }
 0x1bc   : > { %v1356_v10 = vpack.c.bf16 %v822_v6, %v819_v54  ;;  %2031 = vmatpush3.bf16.msra.mxu1 %v1354_v62  ;;  %v1767_v54 = vld [vmem:[#allocation5 + $0x38] sm:$0xff]  }
 0x1bd   : > { %v1355_v13 = vpack.c.bf16 %v814_v9, %v811_v3  ;;  %v1759_v7 = vunpack.c.l.bf16 %v1767_v54 }
 0x1bf   : > { %2005 = vmatpush3.bf16.xpose.msra.mxu0 %v1004_v19  ;;  %v1958_v15 = vpop.f32.mrb[28].mxu0  ;;  %2032 = vmatprep.subr.bf16.mxu1 %v1355_v13 }
 0x1c0   : > { %2006 = vmatprep.subr.bf16.mxu0 %v2832_v16  ;;  %v835_v18 = vadd.f32 %v1958_v15, %v695_v36  ;;  %v826_v19 = vpop.f32.mrb[29].mxu0  ;;  %2033 = vmatpush3.bf16.msra.mxu1 %v1355_v13  ;;  %v1760_v15 = vunpack.c.h.bf16 %v1767_v54 }
 0x1c1   : > { %v827_v59 = vadd.f32 %v826_v19, %v695_v36  ;;  %v1959_v23 = vpop.f32.mrb[30].mxu0  ;;  %2034 = vmatprep.subr.bf16.mxu1 %v1356_v10 }
 0x1c2   : > { %v838_v26 = vadd.f32 %v1959_v23, %v695_v36  ;;  %v829_v28 = vpop.f32.mrb[31].mxu0 }
 0x1c3   : > { %v830_v29 = vadd.f32 %v829_v28, %v695_v36 }
 0x1c4   : > { %v1358_v31 = vpack.c.bf16 %v838_v26, %v835_v18  ;;  %2035 = vmatpush3.bf16.msra.mxu1 %v1356_v10 }
 0x1c7   : > { %2007 = vmatpush3.bf16.xpose.msra.mxu0 %v2832_v16  ;;  %v1357_v16 = vpack.c.bf16 %v830_v29, %v827_v59 }
 0x1c9   : > { %2036 = vmatprep.subr.bf16.mxu1 %v1357_v16 }
 0x1ca   : > { %2037 = vmatpush3.bf16.msra.mxu1 %v1357_v16 }
 0x1cb   : > { %2038 = vmatprep.subr.bf16.mxu1 %v1358_v31 }
 0x1ce   : > { %2009 = vmatmul.mubr.bf16.vlgmr.msra.gmra.mrb[32].mxu0 %v991_v44  ;;  %2039 = vmatpush3.bf16.msra.mxu1 %v1358_v31  ;;  %v1735_v44 = vunpack.c.l.bf16 %v1761_v34 }
 0x1cf   : > { %2012 = vmatprep.mubr.bf16.mxu0 %v992_v4 }
 0x1d6   : > { %2013 = vmatmul.mubr.bf16.gmra.mrb[36].mxu0 %v993_v1  ;;  %v1736_v1 = vunpack.c.h.bf16 %v1761_v34 }
 0x1d7   : > { %2016 = vmatprep.mubr.bf16.mxu0 %v994_v22 }
 0x1de   : > { %2017 = vmatmul.mubr.bf16.gmra.mrb[40].mxu0 %v995_v12 }
 0x1df   : > { %2020 = vmatprep.mubr.bf16.mxu0 %v996_v35  ;;  %v1743_v35 = vunpack.c.l.bf16 %v1763_v27 }
 0x1e6   : > { %2021 = vmatmul.mubr.bf16.gmra.mrb[44].mxu0 %v997_v33 }
 0x2a1   : > { %v2010_v60 = vpop.f32.mrb[32].mxu0 }
 0x2a2   : > { %v2888_v53 = vadd.f32 %v2010_v60, %v1735_v44  ;;  %v1072_v0 = vpop.f32.mrb[33].mxu0 }
 0x2a3   : > { %v2890_v4 = vadd.f32 %v1731_v56, %v1072_v0  ;;  %v2011_v14 = vpop.f32.mrb[34].mxu0 }
 0x2a4   : > { %1139 = vmax.xlane.f32.xlu1 %v2888_v53  ;;  %v1075_v20 = vpop.f32.mrb[35].mxu0  ;;  %v2894_v12 = vadd.f32 %v2011_v14, %v1736_v1 }
 0x2a5   : > { %1135 = vmax.xlane.f32.xlu0 %v2890_v4  ;;  %v2896_v22 = vadd.f32 %v1732_v17, %v1075_v20 }
 0x2a8   : > { %1141 = vmax.xlane.f32.xlu1 %v2894_v12 }
 0x2a9   : > { %v2014_v30 = vpop.f32.mrb[36].mxu0  ;;  %1137 = vmax.xlane.f32.xlu0 %v2896_v22 }
 0x2aa   : > { %v1088_v33 = vpop.f32.mrb[37].mxu0  ;;  %v2905_v43 = vadd.f32 %v2014_v30, %v1743_v35 }
 0x2ab   : > { %v2900_v36 = vadd.f32 %v1739_v24, %v1088_v33  ;;  %v2015_v37 = vpop.f32.mrb[38].mxu0 }
 0x2ac   : > { %v1091_v38 = vpop.f32.mrb[39].mxu0  ;;  %v2908_v25 = vadd.f32 %v2015_v37, %v1744_v41 }
 0x2ad   : > { %v2902_v42 = vadd.f32 %v1740_v32, %v1091_v38  ;;  %1143 = vmax.xlane.f32.xlu0 %v2900_v36 }
 0x2af   : > { %1145 = vmax.xlane.f32.xlu1 %v2902_v42 }
 0x2b1   : > { %v2018_v47 = vpop.f32.mrb[40].mxu0  ;;  %1147 = vmax.xlane.f32.xlu0 %v2905_v43 }
 0x2b2   : > { %v1104_v49 = vpop.f32.mrb[41].mxu0  ;;  %v2917_v63 = vadd.f32 %v2018_v47, %v1751_v50 }
 0x2b3   : > { %v2911_v51 = vadd.f32 %v1747_v45, %v1104_v49  ;;  %v2019_v52 = vpop.f32.mrb[42].mxu0  ;;  %1149 = vmax.xlane.f32.xlu1 %v2908_v25 }
 0x2b4   : > { %v1107_v55 = vpop.f32.mrb[43].mxu0  ;;  %v2920_v2 = vadd.f32 %v2019_v52, %v1752_v61 }
 0x2b5   : > { %v2914_v62 = vadd.f32 %v1748_v48, %v1107_v55  ;;  %1151 = vmax.xlane.f32.xlu0 %v2911_v51 }
 0x2b7   : > { %1153 = vmax.xlane.f32.xlu1 %v2914_v62 }
 0x2b9   : > { %v2022_v3 = vpop.f32.mrb[44].mxu0  ;;  %1155 = vmax.xlane.f32.xlu0 %v2917_v63 }
 0x2ba   : > { %v1120_v6 = vpop.f32.mrb[45].mxu0  ;;  %v2929_v19 = vadd.f32 %v2022_v3, %v1759_v7 }
 0x2bb   : > { %v2923_v9 = vadd.f32 %v1755_v58, %v1120_v6  ;;  %v2023_v10 = vpop.f32.mrb[46].mxu0  ;;  %1157 = vmax.xlane.f32.xlu1 %v2920_v2 }
 0x2bc   : > { %v1123_v13 = vpop.f32.mrb[47].mxu0  ;;  %v2932_v59 = vadd.f32 %v2023_v10, %v1760_v15 }
 0x2bd   : > { %v2926_v18 = vadd.f32 %v1756_v5, %v1123_v13  ;;  %1159 = vmax.xlane.f32.xlu0 %v2923_v9 }
 0x2bf   : > { %1161 = vmax.xlane.f32.xlu1 %v2926_v18 }
 0x2c1   : > { %1163 = vmax.xlane.f32.xlu0 %v2929_v19 }
 0x2c3   : > { %1165 = vmax.xlane.f32.xlu1 %v2932_v59 }
 0x331   : > { %v2936_v23 = vpop.xlane.xlu1 %1139 }
 0x332   : > { %v1169_v26 = vsub.f32 %v2888_v53, %v2936_v23  ;;  %v2940_v28 = vpop.xlane.xlu0 %1135  ;;  %vm1249_vm2 = vcmp.gt.f32.partialorder %v2936_v23, -1e+20 }
 0x333   : > { %v1167_v29 = vsub.f32 %v2890_v4, %v2940_v28  ;;  %vm1247_vm0 = vcmp.gt.f32.partialorder %v2940_v28, -1e+20 }
 0x334   : > { %v1187_v34 = vmul.f32 1.442695, %v1169_v26 }
 0x335   : > { %v1183_v31 = vmul.f32 1.442695, %v1167_v29  ;;  %v2944_v16 = vpop.xlane.xlu1 %1141 }
 0x336   : > { %v1170_v40 = vsub.f32 %v2894_v12, %v2944_v16  ;;  %v2948_v44 = vpop.xlane.xlu0 %1137  ;;  %vm1250_vm3 = vcmp.gt.f32.partialorder %v2944_v16, -1e+20 }
 0x337   : > { %2199 = vpow2.f32 %v1183_v31  ;;  %v1168_v56 = vsub.f32 %v2896_v22, %v2948_v44  ;;  %vm1248_vm1 = vcmp.gt.f32.partialorder %v2948_v44, -1e+20 }
 0x338   : > { %2201 = vpow2.f32 %v1187_v34  ;;  %v1189_v53 = vmul.f32 1.442695, %v1170_v40 }
 0x339   : > { %v1185_v60 = vmul.f32 1.442695, %v1168_v56 }
 0x33a   : > { %v2952_v0 = vpop.xlane.xlu0 %1143 }
 0x33b   : > { %2203 = vpow2.f32 %v1185_v60  ;;  %v1171_v1 = vsub.f32 %v2900_v36, %v2952_v0  ;;  %vm1251_vm4 = vcmp.gt.f32.partialorder %v2952_v0, -1e+20 }
 0x33c   : > { %v2956_v4 = vpop.xlane.xlu1 %1145  ;;  %2205 = vpow2.f32 %v1189_v53 }
 0x33d   : > { %v1191_v14 = vmul.f32 1.442695, %v1171_v1  ;;  %v1172_v17 = vsub.f32 %v2902_v42, %v2956_v4  ;;  %vm1252_vm5 = vcmp.gt.f32.partialorder %v2956_v4, -1e+20 }
 0x33e   : > { %v2960_v20 = vpop.xlane.xlu0 %1147 }
 0x33f   : > { %2207 = vpow2.f32 %v1191_v14  ;;  %v1193_v21 = vmul.f32 1.442695, %v1172_v17  ;;  %v1173_v12 = vsub.f32 %v2905_v43, %v2960_v20  ;;  %v2461_v17 = vmov 0.0  }
 0x340   : > { %v2964_v22 = vpop.xlane.xlu1 %1149  ;;  %v1708_v44 = vsel %vm1249_vm2, 1.0, %v2461_v17  ;;  %vm1253_vm6 = vcmp.gt.f32.partialorder %v2960_v20, -1e+20 }
 0x341   : > { %v2966_v24 = vpop.eup %2199  ;;  %v1195_v27 = vmul.f32 1.442695, %v1173_v12  ;;  %v1174_v30 = vsub.f32 %v2908_v25, %v2964_v22  ;;  %2209 = vpow2.f32 %v1193_v21  ;;  %v1706_v21 = vsel %vm1247_vm0, 1.0, %v2461_v17 }
 0x342   : > { %1215 = vadd.xlane.f32.xlu0 %v2966_v24  ;;  %v2971_v32 = vpop.xlane.xlu0 %1151  ;;  %v2975_v36 = vpop.eup %2201  ;;  %vm1254_vm7 = vcmp.gt.f32.partialorder %v2964_v22, -1e+20  ;;  %v1712_v20 = vsel %vm1253_vm6, 1.0, %v2461_v17 }
 0x343   : > { %2211 = vpow2.f32 %v1195_v27  ;;  %v1197_v33 = vmul.f32 1.442695, %v1174_v30  ;;  %v1175_v35 = vsub.f32 %v2911_v51, %v2971_v32  ;;  %v1707_v30 = vsel %vm1248_vm1, 1.0, %v2461_v17 }
 0x344   : > { %v2977_v37 = vpop.xlane.xlu1 %1153  ;;  %vm1255_vm8 = vcmp.gt.f32.partialorder %v2971_v32, -1e+20 }
 0x345   : > { %v2979_v38 = vpop.eup %2203  ;;  %v1199_v39 = vmul.f32 1.442695, %v1175_v35  ;;  %v1176_v41 = vsub.f32 %v2914_v62, %v2977_v37  ;;  %2213 = vpow2.f32 %v1197_v33  ;;  %vm1256_vm9 = vcmp.gt.f32.partialorder %v2977_v37, -1e+20 }
 0x346   : > { %1219 = vadd.xlane.f32.xlu0 %v2975_v36  ;;  %1217 = vadd.xlane.f32.xlu1 %v2979_v38  ;;  %v2985_v42 = vpop.xlane.xlu0 %1155  ;;  %v2989_v46 = vpop.eup %2205  ;;  %v1714_v32 = vsel %vm1255_vm8, 1.0, %v2461_v17 }
 0x347   : > { %2215 = vpow2.f32 %v1199_v39  ;;  %v1201_v43 = vmul.f32 1.442695, %v1176_v41  ;;  %v1177_v45 = vsub.f32 %v2917_v63, %v2985_v42  ;;  %vm1257_vm10 = vcmp.gt.f32.partialorder %v2985_v42, -1e+20 }
 0x348   : > { %v2991_v25 = vpop.xlane.xlu1 %1157 }
 0x349   : > { %v2993_v47 = vpop.eup %2207  ;;  %v1203_v48 = vmul.f32 1.442695, %v1177_v45  ;;  %v1178_v49 = vsub.f32 %v2920_v2, %v2991_v25  ;;  %2217 = vpow2.f32 %v1201_v43  ;;  %vm1258_vm11 = vcmp.gt.f32.partialorder %v2991_v25, -1e+20 }
 0x34a   : > { %1221 = vadd.xlane.f32.xlu1 %v2989_v46  ;;  %1223 = vadd.xlane.f32.xlu0 %v2993_v47  ;;  %v2999_v50 = vpop.xlane.xlu0 %1159 }
 0x34b   : > { %2219 = vpow2.f32 %v1203_v48  ;;  %v1205_v51 = vmul.f32 1.442695, %v1178_v49  ;;  %v1179_v52 = vsub.f32 %v2923_v9, %v2999_v50  ;;  %v3003_v55 = vpop.eup %2209  ;;  %v1709_v48 = vsel %vm1250_vm3, 1.0, %v2461_v17 }
 0x34c   : > { %v3005_v57 = vpop.xlane.xlu1 %1161  ;;  %vm1259_vm12 = vcmp.gt.f32.partialorder %v2999_v50, -1e+20 }
 0x34d   : > { %v3007_v61 = vpop.eup %2211  ;;  %v1207_v62 = vmul.f32 1.442695, %v1179_v52  ;;  %v1180_v63 = vsub.f32 %v2926_v18, %v3005_v57  ;;  %2221 = vpow2.f32 %v1205_v51  ;;  %vm1260_vm13 = vcmp.gt.f32.partialorder %v3005_v57, -1e+20 }
 0x34e   : > { %1225 = vadd.xlane.f32.xlu1 %v3003_v55  ;;  %1227 = vadd.xlane.f32.xlu0 %v3007_v61  ;;  %v3013_v58 = vpop.xlane.xlu0 %1163 }
 0x34f   : > { %2223 = vpow2.f32 %v1207_v62  ;;  %v1209_v54 = vmul.f32 1.442695, %v1180_v63  ;;  %v1181_v2 = vsub.f32 %v2929_v19, %v3013_v58  ;;  %v3017_v3 = vpop.eup %2213  ;;  %v1710_v63 = vsel %vm1251_vm4, 1.0, %v2461_v17 }
 0x350   : > { %v3019_v5 = vpop.xlane.xlu1 %1165  ;;  %vm1261_vm14 = vcmp.gt.f32.partialorder %v3013_v58, -1e+20 }
 0x351   : > { %v3021_v6 = vpop.eup %2215  ;;  %v1211_v7 = vmul.f32 1.442695, %v1181_v2  ;;  %v1182_v9 = vsub.f32 %v2932_v59, %v3019_v5  ;;  %2225 = vpow2.f32 %v1209_v54  ;;  %v1711_v2 = vsel %vm1252_vm5, 1.0, %v2461_v17 }
 0x352   : > { %1229 = vadd.xlane.f32.xlu1 %v3017_v3  ;;  %1231 = vadd.xlane.f32.xlu0 %v3021_v6  ;;  %vm1262_vm15 = vcmp.gt.f32.partialorder %v3019_v5, -1e+20 }
 0x353   : > { %2227 = vpow2.f32 %v1211_v7  ;;  %v1213_v10 = vmul.f32 1.442695, %v1182_v9  ;;  %v3027_v13 = vpop.eup %2217 }
 0x355   : > { %v3029_v15 = vpop.eup %2219  ;;  %2229 = vpow2.f32 %v1213_v10 }
 0x356   : > { %1233 = vadd.xlane.f32.xlu1 %v3027_v13  ;;  %1235 = vadd.xlane.f32.xlu0 %v3029_v15 }
 0x357   : > { %v3033_v18 = vpop.eup %2221 }
 0x359   : > { %v3035_v19 = vpop.eup %2223 }
 0x35a   : > { %1237 = vadd.xlane.f32.xlu1 %v3033_v18  ;;  %1239 = vadd.xlane.f32.xlu0 %v3035_v19 }
 0x35b   : > { %v3039_v59 = vpop.eup %2225 }
 0x35d   : > { %v3041_v26 = vpop.eup %2227 }
 0x35e   : > { %1241 = vadd.xlane.f32.xlu1 %v3039_v59  ;;  %1243 = vadd.xlane.f32.xlu0 %v3041_v26 }
 0x35f   : > { %v3045_v29 = vpop.eup %2229 }
 0x362   : > { %1245 = vadd.xlane.f32.xlu1 %v3045_v29 }
 0x3cf   : > { %v1216_v31 = vpop.xlane.xlu0 %1215 }
 0x3d0   : > { %2231 = vrcp.f32 %v1216_v31 }
 0x3d3   : > { %v1218_v34 = vpop.xlane.xlu1 %1217  ;;  %v1220_v40 = vpop.xlane.xlu0 %1219 }
 0x3d4   : > { %2233 = vrcp.f32 %v1218_v34 }
 0x3d5   : > { %2235 = vrcp.f32 %v1220_v40 }
 0x3d7   : > { %v1222_v56 = vpop.xlane.xlu1 %1221  ;;  %v1224_v60 = vpop.xlane.xlu0 %1223 }
 0x3d8   : > { %2237 = vrcp.f32 %v1222_v56  ;;  %v1713_v56 = vsel %vm1254_vm7, 1.0, %v2461_v17 }
 0x3d9   : > { %2239 = vrcp.f32 %v1224_v60 }
 0x3da   : > { %v2232_v53 = vpop.eup %2231 }
 0x3db   : > { %v1226_v1 = vpop.xlane.xlu1 %1225  ;;  %v1228_v14 = vpop.xlane.xlu0 %1227  ;;  %v1311_v12 = vmul.f32 %v2232_v53, %v1706_v21 }
 0x3dc   : > { %2241 = vrcp.f32 %v1226_v1 }
 0x3dd   : > { %2243 = vrcp.f32 %v1228_v14  ;;  %v1327_v23 = vmul.f32 %v2966_v24, %v1311_v12 }
 0x3de   : > { %v2234_v27 = vpop.eup %2233 }
 0x3df   : > { %v2236_v33 = vpop.eup %2235  ;;  %v1230_v28 = vpop.xlane.xlu1 %1229  ;;  %v1312_v39 = vmul.f32 %v2234_v27, %v1707_v30  ;;  %v1715_v27 = vsel %vm1256_vm9, 1.0, %v2461_v17 }
 0x3e0   : > { %v1232_v35 = vpop.xlane.xlu0 %1231  ;;  %2245 = vrcp.f32 %v1230_v28  ;;  %v1313_v41 = vmul.f32 %v2236_v33, %v1708_v44  ;;  %v1717_v44 = vsel %vm1258_vm11, 1.0, %v2461_v17 }
 0x3e1   : > { %2247 = vrcp.f32 %v1232_v35  ;;  %v1328_v43 = vmul.f32 %v2979_v38, %v1312_v39  ;;  %v1716_v35 = vsel %vm1257_vm10, 1.0, %v2461_v17 }
 0x3e2   : > { %v2238_v45 = vpop.eup %2237  ;;  %v1329_v0 = vmul.f32 %v2975_v36, %v1313_v41 }
 0x3e3   : > { %v2240_v49 = vpop.eup %2239  ;;  %v1314_v16 = vmul.f32 %v2238_v45, %v1709_v48  ;;  %v1234_v51 = vpop.xlane.xlu1 %1233  ;;  %v1343_v62 = vpack.c.bf16 %v1328_v43, %v1327_v23  ;;  %v1718_v43 = vsel %vm1259_vm12, 1.0, %v2461_v17  ;;  %v1719_v48 = vsel %vm1260_vm13, 1.0, %v2461_v17 }
 0x3e4   : > { %v1236_v52 = vpop.xlane.xlu0 %1235  ;;  %2249 = vrcp.f32 %v1234_v51  ;;  %v1315_v38 = vmul.f32 %v2240_v49, %v1710_v63  ;;  %v1720_v51 = vsel %vm1261_vm14, 1.0, %v2461_v17 }
 0x3e5   : > { %v1330_v24 = vmul.f32 %v2989_v46, %v1314_v16  ;;  %2251 = vrcp.f32 %v1236_v52  ;;  %2040 = vmatprep.mubr.bf16.mxu1 %v1343_v62 }
 0x3e6   : > { %v2242_v54 = vpop.eup %2241  ;;  %v1331_v36 = vmul.f32 %v2993_v47, %v1315_v38 }
 0x3e7   : > { %v2244_v4 = vpop.eup %2243  ;;  %v1238_v7 = vpop.xlane.xlu1 %1237  ;;  %v1344_v10 = vpack.c.bf16 %v1330_v24, %v1329_v0  ;;  %v1316_v31 = vmul.f32 %v2242_v54, %v1711_v2  ;;  %v843_v54 = vsub.s32 3, %v2765_v8 }
 0x3e8   : > { %v1240_v9 = vpop.xlane.xlu0 %1239  ;;  %2253 = vrcp.f32 %v1238_v7  ;;  %v1317_v34 = vmul.f32 %v2244_v4, %v1712_v20 }
 0x3e9   : > { %2255 = vrcp.f32 %v1240_v9  ;;  %2041 = vmatmul.mubr.bf16.vlgmr.msra.gmra.mrb[16].mxu1 %v1344_v10  ;;  %v1332_v46 = vmul.f32 %v3003_v55, %v1316_v31  ;;  %v844_v2 = vrot.slane %v2771_v11, %v843_v54 }
 0x3ea   : > { %v2246_v40 = vpop.eup %2245  ;;  %v1333_v47 = vmul.f32 %v3007_v61, %v1317_v34 }
 0x3eb   : > { %v2248_v22 = vpop.eup %2247  ;;  %v1242_v60 = vpop.xlane.xlu1 %1241  ;;  %v1345_v1 = vpack.c.bf16 %v1332_v46, %v1331_v36  ;;  %v1318_v14 = vmul.f32 %v2246_v40, %v1713_v56 }
 0x3ec   : > { %v1244_v53 = vpop.xlane.xlu0 %1243  ;;  %2257 = vrcp.f32 %v1242_v60  ;;  %v1319_v21 = vmul.f32 %v2248_v22, %v1714_v32 }
 0x3ed   : > { %2259 = vrcp.f32 %v1244_v53  ;;  %2044 = vmatprep.mubr.bf16.mxu1 %v1345_v1  ;;  %v1334_v55 = vmul.f32 %v3017_v3, %v1318_v14 }
 0x3ee   : > { %v2250_v12 = vpop.eup %2249  ;;  %v1335_v42 = vmul.f32 %v3021_v6, %v1319_v21 }
 0x3ef   : > { %v2252_v37 = vpop.eup %2251  ;;  %v1246_v30 = vpop.xlane.xlu1 %1245  ;;  %v1346_v33 = vpack.c.bf16 %v1334_v55, %v1333_v47  ;;  %v1320_v28 = vmul.f32 %v2250_v12, %v1715_v27 }
 0x3f0   : > { %2261 = vrcp.f32 %v1246_v30  ;;  %v1321_v3 = vmul.f32 %v2252_v37, %v1716_v35 }
 0x3f1   : > { %2045 = vmatmul.mubr.bf16.gmra.mrb[20].mxu1 %v1346_v33  ;;  %v1336_v61 = vmul.f32 %v3027_v13, %v1320_v28 }
 0x3f2   : > { %v2254_v39 = vpop.eup %2253  ;;  %v1337_v50 = vmul.f32 %v3029_v15, %v1321_v3 }
 0x3f3   : > { %v2256_v41 = vpop.eup %2255  ;;  %v1347_v25 = vpack.c.bf16 %v1336_v61, %v1335_v42  ;;  %v1322_v23 = vmul.f32 %v2254_v39, %v1717_v44 }
 0x3f4   : > { %v1323_v45 = vmul.f32 %v2256_v41, %v1718_v43 }
 0x3f5   : > { %2048 = vmatprep.mubr.bf16.mxu1 %v1347_v25  ;;  %v1338_v6 = vmul.f32 %v3033_v18, %v1322_v23  ;;  %v1721_v18 = vsel %vm1262_vm15, 1.0, %v2461_v17 }
 0x3f6   : > { %v2258_v13 = vpop.eup %2257  ;;  %v1339_v52 = vmul.f32 %v3035_v19, %v1323_v45 }
 0x3f7   : > { %v2260_v49 = vpop.eup %2259  ;;  %v1348_v16 = vpack.c.bf16 %v1338_v6, %v1337_v50  ;;  %v1324_v57 = vmul.f32 %v2258_v13, %v1719_v48 }
 0x3f8   : > { %v1325_v62 = vmul.f32 %v2260_v49, %v1720_v51 }
 0x3f9   : > { %2049 = vmatmul.mubr.bf16.gmra.mrb[24].mxu1 %v1348_v16  ;;  %v1340_v58 = vmul.f32 %v3039_v59, %v1324_v57 }
 0x3fa   : > { %v2262_v15 = vpop.eup %2261  ;;  %v1341_v24 = vmul.f32 %v3041_v26, %v1325_v62 }
 0x3fb   : > { %v1349_v63 = vpack.c.bf16 %v1340_v58, %v1339_v52  ;;  %v1326_v0 = vmul.f32 %v2262_v15, %v1721_v18 }
 0x3fd   : > { %2052 = vmatprep.mubr.bf16.mxu1 %v1349_v63  ;;  %v1342_v5 = vmul.f32 %v3045_v29, %v1326_v0 }
 0x3ff   : > { %v1350_v38 = vpack.c.bf16 %v1342_v5, %v1341_v24 }
 0x401   : > { %2053 = vmatmul.mubr.bf16.gmra.mrb[28].mxu1 %v1350_v38 }
 0x4bc   : > { %v2042_v19 = vpop.f32.mrb[16].mxu1 }
 0x4bd   : > { %v3098_v4 = vadd.f32 %v2042_v19, %v844_v2  ;;  %v1393_v59 = vpop.f32.mrb[17].mxu1 }
 0x4be   : > { %v3100_v7 = vadd.f32 %v1393_v59, %v844_v2  ;;  %v2043_v17 = vpop.f32.mrb[18].mxu1 }
 0x4bf   : > { %v3102_v9 = vadd.f32 %v2043_v17, %v844_v2  ;;  %v1396_v10 = vpop.f32.mrb[19].mxu1  ;;  %v1462_v42 = vmax.f32 (!%p1722_p6), %v3098_v4, 0.0 }
 0x4c0   : > { %v2059_v31 = vadd.f32 %v1396_v10, %v844_v2  ;;  %v1460_v28 = vmax.f32 (!%p1722_p6), %v3100_v7, 0.0 }
 0x4c1   : > { %v1463_v61 = vmax.f32 (!%p1722_p6), %v3102_v9, 0.0  ;;  %1478 = vst [vmem:[#allocation9 + $0x10] sm:$0xff] (!%p1722_p6), %v1462_v42 }
 0x4c2   : > { %v1461_v35 = vmax.f32 (!%p1722_p6), %v2059_v31, 0.0  ;;  %1476 = vst [vmem:[#allocation9] sm:$0xff] (!%p1722_p6), %v1460_v28 }
 0x4c3   : > { %1479 = vst [vmem:[#allocation9 + $0x18] sm:$0xff] (!%p1722_p6), %v1463_v61 }
 0x4c4   : > { %v2046_v26 = vpop.f32.mrb[20].mxu1  ;;  %1477 = vst [vmem:[#allocation9 + $0x8] sm:$0xff] (!%p1722_p6), %v1461_v35 }
 0x4c5   : > { %v3104_v20 = vadd.f32 %v2046_v26, %v844_v2  ;;  %v1409_v29 = vpop.f32.mrb[21].mxu1 }
 0x4c6   : > { %v2061_v36 = vadd.f32 %v1409_v29, %v844_v2  ;;  %v2047_v46 = vpop.f32.mrb[22].mxu1 }
 0x4c7   : > { %v2062_v8 = vadd.f32 %v2047_v46, %v844_v2  ;;  %v1412_v34 = vpop.f32.mrb[23].mxu1  ;;  %v1466_v44 = vmax.f32 (!%p1722_p6), %v3104_v20, 0.0 }
 0x4c8   : > { %v2063_v11 = vadd.f32 %v1412_v34, %v844_v2  ;;  %v1464_v3 = vmax.f32 (!%p1722_p6), %v2061_v36, 0.0 }
 0x4c9   : > { %v1467_v41 = vmax.f32 (!%p1722_p6), %v2062_v8, 0.0  ;;  %1482 = vst [vmem:[#allocation9 + $0x30] sm:$0xff] (!%p1722_p6), %v1466_v44 }
 0x4ca   : > { %v1465_v39 = vmax.f32 (!%p1722_p6), %v2063_v11, 0.0  ;;  %1480 = vst [vmem:[#allocation9 + $0x20] sm:$0xff] (!%p1722_p6), %v1464_v3 }
 0x4cb   : > { %1483 = vst [vmem:[#allocation9 + $0x38] sm:$0xff] (!%p1722_p6), %v1467_v41 }
 0x4cc   : > { %v2050_v40 = vpop.f32.mrb[24].mxu1  ;;  %1481 = vst [vmem:[#allocation9 + $0x28] sm:$0xff] (!%p1722_p6), %v1465_v39 }
 0x4cd   : > { %v2064_v56 = vadd.f32 %v2050_v40, %v844_v2  ;;  %v1425_v22 = vpop.f32.mrb[25].mxu1 }
 0x4ce   : > { %v2065_v60 = vadd.f32 %v1425_v22, %v844_v2  ;;  %v2051_v53 = vpop.f32.mrb[26].mxu1 }
 0x4cf   : > { %v2066_v1 = vadd.f32 %v2051_v53, %v844_v2  ;;  %v1428_v14 = vpop.f32.mrb[27].mxu1  ;;  %v1470_v43 = vmax.f32 (!%p1722_p6), %v2064_v56, 0.0 }
 0x4d0   : > { %v2067_v32 = vadd.f32 %v1428_v14, %v844_v2  ;;  %v1468_v25 = vmax.f32 (!%p1722_p6), %v2065_v60, 0.0 }
 0x4d1   : > { %v1471_v50 = vmax.f32 (!%p1722_p6), %v2066_v1, 0.0  ;;  %1486 = vst [vmem:[#allocation9 + $0x50] sm:$0xff] (!%p1722_p6), %v1470_v43 }
 0x4d2   : > { %1459 = sbr.rel (%p1722_p6) target bundleno = 1245 (0x4dd), region = 60  ;;  %v1469_v23 = vmax.f32 (!%p1722_p6), %v2067_v32, 0.0  ;;  %1484 = vst [vmem:[#allocation9 + $0x40] sm:$0xff] (!%p1722_p6), %v1468_v25 }
 0x4d3   : > { %1487 = vst [vmem:[#allocation9 + $0x58] sm:$0xff] (!%p1722_p6), %v1471_v50 }
 0x4d4   : > { %v2054_v47 = vpop.f32.mrb[28].mxu1  ;;  %1485 = vst [vmem:[#allocation9 + $0x48] sm:$0xff] (!%p1722_p6), %v1469_v23 }
 0x4d5   : > { %v2068_v55 = vadd.f32 %v2054_v47, %v844_v2  ;;  %v1441_v21 = vpop.f32.mrb[29].mxu1 }
 0x4d6   : > { %v2069_v12 = vadd.f32 %v1441_v21, %v844_v2  ;;  %v2055_v27 = vpop.f32.mrb[30].mxu1 }
 0x4d7   : > { %v2070_v37 = vadd.f32 %v2055_v27, %v844_v2  ;;  %v1444_v30 = vpop.f32.mrb[31].mxu1  ;;  %v1474_v13 = vmax.f32 (!%p1722_p6), %v2068_v55, 0.0 }
 0x4d8   : > { %v2071_v33 = vadd.f32 %v1444_v30, %v844_v2  ;;  %v1472_v6 = vmax.f32 (!%p1722_p6), %v2069_v12, 0.0 }
 0x4d9   : > { %v1475_v48 = vmax.f32 %v2070_v37, 0.0  ;;  %1490 = vst [vmem:[#allocation9 + $0x70] sm:$0xff] %v1474_v13 }
 0x4da   : > { %v1473_v45 = vmax.f32 %v2071_v33, 0.0  ;;  %1488 = vst [vmem:[#allocation9 + $0x60] sm:$0xff] %v1472_v6 }
 0x4db   : > { %1491 = vst [vmem:[#allocation9 + $0x78] sm:$0xff] %v1475_v48 }
 0x4dc   : > { %1489 = vst [vmem:[#allocation9 + $0x68] sm:$0xff] %v1473_v45 }
 0x4dd PF: > { %p1723_p0 = scmp.ne.s32.totalorder %s2509_s19, 2 }
 0x4de   : > { %1496 = vst [vmem:[#allocation9] sm:$0xff] (!%p1723_p0), %v3100_v7  ;;  %1497 = vst [vmem:[#allocation9 + $0x8] sm:$0xff] (!%p1723_p0), %v2059_v31 }
 0x4df   : > { %1495 = sbr.rel (%p1723_p0) target bundleno = 1254 (0x4e6), region = 64  ;;  %1498 = vst [vmem:[#allocation9 + $0x10] sm:$0xff] (!%p1723_p0), %v3098_v4  ;;  %1499 = vst [vmem:[#allocation9 + $0x18] sm:$0xff] (!%p1723_p0), %v3102_v9 }
 0x4e0   : > { %1500 = vst [vmem:[#allocation9 + $0x20] sm:$0xff] (!%p1723_p0), %v2061_v36  ;;  %1501 = vst [vmem:[#allocation9 + $0x28] sm:$0xff] (!%p1723_p0), %v2063_v11 }
 0x4e1   : > { %1502 = vst [vmem:[#allocation9 + $0x30] sm:$0xff] (!%p1723_p0), %v3104_v20  ;;  %1503 = vst [vmem:[#allocation9 + $0x38] sm:$0xff] (!%p1723_p0), %v2062_v8 }
 0x4e2   : > { %1504 = vst [vmem:[#allocation9 + $0x40] sm:$0xff] (!%p1723_p0), %v2065_v60  ;;  %1505 = vst [vmem:[#allocation9 + $0x48] sm:$0xff] (!%p1723_p0), %v2067_v32 }
 0x4e3   : > { %1506 = vst [vmem:[#allocation9 + $0x50] sm:$0xff] (!%p1723_p0), %v2064_v56  ;;  %1507 = vst [vmem:[#allocation9 + $0x58] sm:$0xff] (!%p1723_p0), %v2066_v1 }
 0x4e4   : > { %1508 = vst [vmem:[#allocation9 + $0x60] sm:$0xff] (!%p1723_p0), %v2069_v12  ;;  %1509 = vst [vmem:[#allocation9 + $0x68] sm:$0xff] (!%p1723_p0), %v2071_v33 }
 0x4e5   : > { %1510 = vst [vmem:[#allocation9 + $0x70] sm:$0xff] (!%p1723_p0), %v2068_v55  ;;  %1511 = vst [vmem:[#allocation9 + $0x78] sm:$0xff] (!%p1723_p0), %v2070_v37 }
 0x4e6 PF: > { %s2462_s25 = smov [#allocation9]  }
 0x4e7   : > { %s1518_s27 = sshll.u32 %s2462_s25, 4  ;;  %s1519_s27 = int_to_ptr.vmem [resolvable:$true] %s1518_s27 }
 0x4e8   : > { %s2379_s5 = scalar_lea.vmem %s1519_s27, 2048  ;;  %p2386_p11 = scmp.lt.s32.totalorder %s1519_s27, %s1519_s27 }
 0x4e9   : > { %p2380_p8 = scmp.ne.s32.totalorder %s1519_s27, %s2379_s5  ;;  %p2387_p12 = scmp.lt.s32.totalorder %s2379_s5, %s2379_s5 }
 0x4eb   : > { %p2381_p2 = pnand %p2380_p8, %p1722_p6  ;;  %p2388_p7 = por %p2387_p12, %p2386_p11 }
 0x4ed   : > { %p2382_p4 = pneg %p2381_p2 }
 0x4ef   : > { %p2389_p13 = pnand %p2388_p7, %p2382_p4 }
 0x4f1   : > { %2392 = shalt.err (!%p2389_p13)
}
 0x4f2   : > { %s2393_s28 = scalar_lea.hbm %s3157_s4, 2048 }
 0x4f3   : > { %p2394_p5 = scmp.ne.s32.totalorder %s3157_s4, %s2393_s28  ;;  %p2399_p9 = scmp.lt.u32.totalorder %s2393_s28, %s3157_s4 }
 0x4f5   : > { %p2395_p10 = pnand %p2394_p5, %p1722_p6 }
 0x4f7   : > { %p2396_p1 = pneg %p2395_p10 }
 0x4f9   : > { %p2401_p3 = pnand %p2399_p9, %p2396_p1 }
 0x4fb   : > { %2404 = shalt.err (!%p2401_p3)
}
 0x4fc   : > { %s2463_s14 = smov 128   ;;  %s2464_s7 = smov 8  }
 0x4fd   : > { %2101 = dma.vmem_to_hbm [thread:$0]  (%p1722_p6), %s1519_s27, 2048, %s3157_s4, [#allocation4], %s2463_s14, %s2463_s14, %s2464_s7  }
 0x4fe   : > { %2434 = dma.done.wait (%p1722_p6), [#allocation4], 2048  }
 0x4ff   : > { %2436 = vsyncadd (%p1722_p6), [#allocation4], 4294965248 }
 0x500 PF: > { %p14_p0 = scmp.ge.s32.totalorder %s2512_s20, 5   ;;  %s3183_s15 = smov %s2443_s16 }
 0x501   : > { %s3184_s16 = smov %s2447_s17  ;;  %s3185_s17 = smov %s2522_s23 }
 0x502   : > { %s3186_s18 = smov %s2512_s20  ;;  %16 = sbr.rel (!%p14_p0) target bundleno = 4 (0x4), region = 106 }
 0x509   :  { %1534 = vsyncpa [#allocation3], 1 }
 0x50a   :  { %1536 = vsyncpa [#allocation3 + $0x1], 1 }
 0x50b   :  { %1537 = vsyncpa [#allocation6], 1 }
 0x50c   :  { %1538 = vsyncpa [#allocation4], 1 }
 0x50d   :  { %1540 = vsyncpa [#allocation4 + $0x1], 1 }

</bundles_post_ra>
